<compile_context>
chip_gen: v7x
topology: tpu7x:2x2x1
jax: 0.10.0
libtpu: 0.0.40
codegen_flags: <defaults>
</compile_context>

<pallas_src>
from functools import partial

import jax
import jax.numpy as jnp
from jax.experimental import pallas as pl
from jax.experimental.pallas import tpu as pltpu


def _round_up(x, m):
    return ((x + m - 1) // m) * m


def highway_kernel(x_ref, w_ref, b_ref, o_ref, *, n_layers, d):
    """One row-tile of the highway network.

    x_ref : (tm, d)       f32 input tile (embedding dim lane-padded to d)
    w_ref : (L, d, 2d)    bf16 fused [normal | gate] weights (y = x @ w layout)
    b_ref : (L, 2d)       f32 fused biases
    o_ref : (tm, d)       f32 output tile
    """
    x = x_ref[...].astype(jnp.float32)
    for l in range(n_layers):                      # small static L -> unrolled
        # One fused MXU projection per layer: columns [0:d]=normal, [d:2d]=gate.
        proj = jnp.dot(x.astype(jnp.bfloat16), w_ref[l],
                       preferred_element_type=jnp.float32)
        proj = proj + b_ref[l][None, :]
        normal = jnp.maximum(proj[:, :d], 0.0)      # ReLU    (VPU, f32)
        gate = jax.nn.sigmoid(proj[:, d:])          # Sigmoid (EUP, f32)
        x = x + gate * (normal - x)                 # highway mix (1 mul, 2 add)
    o_ref[...] = x.astype(o_ref.dtype)


def highway_pallas(x, wn_t, bn, wg_t, bg, *, tm=256):
    """x: (B, W, D) f32; wn_t/wg_t: (L, D, D) pre-transposed (y = x @ w + b);
    bn/bg: (L, D)."""
    B, W, D = x.shape
    L = wn_t.shape[0]
    rows = B * W

    # Lane-dense padding: embedding dim to a multiple of 128 so every vreg lane
    # is used and output stores are unmasked.  Padded lanes stay exactly zero
    # through the highway mix (zero weight cols/bias -> relu(0)=0, x_pad=0,
    # g*(0-0)=0).
    Dp = _round_up(max(D, 128), 128)
    # Row padding so arbitrary B*W works with a large, MXU-filling row tile.
    rows_p = _round_up(rows, tm)

    xf = x.reshape(rows, D).astype(jnp.float32)
    xf = jnp.pad(xf, ((0, rows_p - rows), (0, Dp - D)))

    pad_w = ((0, 0), (0, Dp - D), (0, Dp - D))
    pad_b = ((0, 0), (0, Dp - D))
    # Fuse normal+gate along the output dim -> one (Dp, 2*Dp) matmul per layer.
    w_fused = jnp.concatenate(
        [jnp.pad(wn_t, pad_w), jnp.pad(wg_t, pad_w)], axis=2
    ).astype(jnp.bfloat16)                                   # (L, Dp, 2*Dp)
    b_fused = jnp.concatenate(
        [jnp.pad(bn, pad_b), jnp.pad(bg, pad_b)], axis=1
    ).astype(jnp.float32)                                    # (L, 2*Dp)

    grid = (rows_p // tm,)

    flops = 2 * L * rows_p * Dp * (2 * Dp) + 6 * L * rows_p * Dp
    transcendentals = L * rows_p * Dp                        # sigmoid
    bytes_accessed = (2 * rows_p * Dp * 4                    # x in + out (f32)
                      + L * Dp * 2 * Dp * 2                  # fused bf16 weights
                      + L * 2 * Dp * 4)                      # fused f32 biases

    out = pl.pallas_call(
        partial(highway_kernel, n_layers=L, d=Dp),
        out_shape=jax.ShapeDtypeStruct((rows_p, Dp), jnp.float32),
        grid_spec=pltpu.PrefetchScalarGridSpec(
            num_scalar_prefetch=0,
            grid=grid,
            in_specs=[
                pl.BlockSpec((tm, Dp), lambda i: (i, 0)),            # x tile
                pl.BlockSpec((L, Dp, 2 * Dp), lambda i: (0, 0, 0)),  # fused W (resident)
                pl.BlockSpec((L, 2 * Dp), lambda i: (0, 0)),         # fused b (resident)
            ],
            out_specs=pl.BlockSpec((tm, Dp), lambda i: (i, 0)),
        ),
        compiler_params=pltpu.CompilerParams(
            # Single parallel row axis: shardable across v7x's 2 TensorCores.
            dimension_semantics=("parallel",),
            vmem_limit_bytes=32 * 1024 * 1024),
        cost_estimate=pl.CostEstimate(
            flops=int(flops),
            transcendentals=int(transcendentals),
            bytes_accessed=int(bytes_accessed)),
    )(xf, w_fused, b_fused)

    return out[:rows, :D].reshape(B, W, D).astype(x.dtype)


# ---------------- plain-JAX glue: sub-embeddors + reference ----------------

def concat_embeddings(words, chars, word_table, char_table):
    # TODO(synk): embedding-table gathers (word/char lookup) stay in plain JAX;
    # data-dependent gathers have no clean rectangular-BlockSpec Pallas form.
    word_emb = jnp.take(word_table, words, axis=0)               # (B, W, d_word)
    char_emb = jnp.take(char_table, chars, axis=0).mean(axis=2)  # (B, W, d_char)
    return jnp.concatenate([word_emb, char_emb], axis=2)         # (B, W, D)


def highway_reference(x, wn_t, bn, wg_t, bg):
    for l in range(wn_t.shape[0]):
        normal = jax.nn.relu(x @ wn_t[l] + bn[l])
        gate = jax.nn.sigmoid(x @ wg_t[l] + bg[l])
        x = gate * normal + (1.0 - gate) * x
    return x


if __name__ == "__main__":
    key = jax.random.PRNGKey(0)
    (k_words, k_chars, k_wtab, k_ctab,
     k_wn, k_bn, k_wg, k_bg) = jax.random.split(key, 8)

    # Small deterministic synthetic setup. rows = 4*96 = 384 -> padded to 512
    # (exercises both row padding and the 2-step parallel grid).
    batch, max_words, max_chars = 4, 96, 8
    word_vocab, char_vocab = 50, 30
    d_word, d_char = 16, 16
    D = d_word + d_char            # embedding_dim of the concatenating embeddor
    n_layers = 2

    words = jax.random.randint(k_words, (batch, max_words), 0, word_vocab)
    chars = jax.random.randint(k_chars, (batch, max_words, max_chars), 0, char_vocab)

    word_table = jax.random.normal(k_wtab, (word_vocab, d_word), jnp.float32) * 0.1
    char_table = jax.random.normal(k_ctab, (char_vocab, d_char), jnp.float32) * 0.1

    # nn.Linear(D, D) params per highway layer, stored pre-transposed (D_in, D_out).
    wn_t = jax.random.normal(k_wn, (n_layers, D, D), jnp.float32) * (1.0 / jnp.sqrt(D))
    bn = jax.random.normal(k_bn, (n_layers, D), jnp.float32) * 0.05
    wg_t = jax.random.normal(k_wg, (n_layers, D, D), jnp.float32) * (1.0 / jnp.sqrt(D))
    bg = jax.random.normal(k_bg, (n_layers, D), jnp.float32) * 0.05

    # Glue: concatenated sub-embeddings (B, W, D).
    emb = concat_embeddings(words, chars, word_table, char_table)

    # Pallas kernel: highway network over the concatenated embeddings.
    out = highway_pallas(emb, wn_t, bn, wg_t, bg, tm=256)
    out = jax.block_until_ready(out)

    # Sanity check against a pure-f32 JAX reference (kernel uses bf16 MXU
    # operands with f32 accumulation -> small, bounded deviation).
    ref = highway_reference(emb, wn_t, bn, wg_t, bg)
    assert out.shape == (batch, max_words, D)
    assert jnp.allclose(out, ref, atol=2e-2, rtol=2e-2), "mismatch vs reference"

    print("KERNEL_OK")
</pallas_src>

<mosaic_0001>
module attributes {stable_mosaic.version = 11 : i64} {
  func.func @highway_kernel(%arg0: i32, %arg1: memref<256x128xf32, #tpu.memory_space<vmem>>, %arg2: memref<2x128x256xbf16, #tpu.memory_space<vmem>>, %arg3: memref<2x256xf32, #tpu.memory_space<vmem>>, %arg4: memref<256x128xf32, #tpu.memory_space<vmem>>) attributes {dimension_semantics = [#tpu.dimension_semantics<parallel>], iteration_bounds = array<i64: 2>, scalar_prefetch = 0 : i64, scratch_operands = 0 : i64, tpu.core_type = #tpu.core_type<tc>, window_params = [{transform_indices = @transform_0, window_bounds = array<i64: 256, 128>}, {pipeline_mode = #tpu.pipeline_mode<synchronous>, transform_indices = @transform_1, window_bounds = array<i64: 2, 128, 256>}, {pipeline_mode = #tpu.pipeline_mode<synchronous>, transform_indices = @transform_2, window_bounds = array<i64: 2, 256>}, {transform_indices = @transform_3, window_bounds = array<i64: 256, 128>}]} {
    %c0 = arith.constant 0 : index
    %c0_0 = arith.constant 0 : index
    %0 = vector.load %arg1[%c0, %c0_0] : memref<256x128xf32, #tpu.memory_space<vmem>>, vector<256x128xf32>
    %1 = arith.truncf %0 : vector<256x128xf32> to vector<256x128xbf16>
    %c0_1 = arith.constant 0 : index
    %c0_2 = arith.constant 0 : index
    %c0_3 = arith.constant 0 : index
    %2 = vector.load %arg2[%c0_1, %c0_2, %c0_3] : memref<2x128x256xbf16, #tpu.memory_space<vmem>>, vector<1x128x256xbf16>
    %3 = vector.shape_cast %2 : vector<1x128x256xbf16> to vector<128x256xbf16>
    %cst = arith.constant dense<0.000000e+00> : vector<256x256xf32>
    %4 = tpu.matmul %1, %3, %cst {dimension_numbers = #tpu.dot_dimension_numbers<[1], [0], [0], [1], [0, 0, 1, 1], [], []>} : vector<256x128xbf16>, vector<128x256xbf16>, vector<256x256xf32> -> vector<256x256xf32>
    %c0_4 = arith.constant 0 : index
    %c0_5 = arith.constant 0 : index
    %5 = vector.load %arg3[%c0_4, %c0_5] : memref<2x256xf32, #tpu.memory_space<vmem>>, vector<1x256xf32>
    %6 = vector.shape_cast %5 : vector<1x256xf32> to vector<256xf32>
    %7 = vector.shape_cast %6 : vector<256xf32> to vector<1x256xf32>
    %8 = vector.broadcast %7 : vector<1x256xf32> to vector<256x256xf32>
    %9 = arith.addf %4, %8 : vector<256x256xf32>
    %10 = vector.extract_strided_slice %9 {offsets = [0, 0], sizes = [256, 128], strides = [1, 1]} : vector<256x256xf32> to vector<256x128xf32>
    %cst_6 = arith.constant 0.000000e+00 : f32
    %11 = vector.broadcast %cst_6 : f32 to vector<256x128xf32>
    %12 = arith.maximumf %10, %11 : vector<256x128xf32>
    %13 = vector.extract_strided_slice %9 {offsets = [0, 128], sizes = [256, 128], strides = [1, 1]} : vector<256x256xf32> to vector<256x128xf32>
    %14 = arith.negf %13 : vector<256x128xf32>
    %15 = math.exp %14 : vector<256x128xf32>
    %cst_7 = arith.constant 1.000000e+00 : f32
    %16 = vector.broadcast %cst_7 : f32 to vector<256x128xf32>
    %17 = arith.addf %16, %15 : vector<256x128xf32>
    %18 = arith.divf %16, %17 : vector<256x128xf32>
    %19 = arith.subf %12, %0 : vector<256x128xf32>
    %20 = arith.mulf %18, %19 : vector<256x128xf32>
    %21 = arith.addf %0, %20 : vector<256x128xf32>
    %22 = arith.truncf %21 : vector<256x128xf32> to vector<256x128xbf16>
    %c1 = arith.constant 1 : index
    %c0_8 = arith.constant 0 : index
    %c0_9 = arith.constant 0 : index
    %23 = vector.load %arg2[%c1, %c0_8, %c0_9] : memref<2x128x256xbf16, #tpu.memory_space<vmem>>, vector<1x128x256xbf16>
    %24 = vector.shape_cast %23 : vector<1x128x256xbf16> to vector<128x256xbf16>
    %cst_10 = arith.constant dense<0.000000e+00> : vector<256x256xf32>
    %25 = tpu.matmul %22, %24, %cst_10 {dimension_numbers = #tpu.dot_dimension_numbers<[1], [0], [0], [1], [0, 0, 1, 1], [], []>} : vector<256x128xbf16>, vector<128x256xbf16>, vector<256x256xf32> -> vector<256x256xf32>
    %c1_11 = arith.constant 1 : index
    %c0_12 = arith.constant 0 : index
    %26 = vector.load %arg3[%c1_11, %c0_12] : memref<2x256xf32, #tpu.memory_space<vmem>>, vector<1x256xf32>
    %27 = vector.shape_cast %26 : vector<1x256xf32> to vector<256xf32>
    %28 = vector.shape_cast %27 : vector<256xf32> to vector<1x256xf32>
    %29 = vector.broadcast %28 : vector<1x256xf32> to vector<256x256xf32>
    %30 = arith.addf %25, %29 : vector<256x256xf32>
    %31 = vector.extract_strided_slice %30 {offsets = [0, 0], sizes = [256, 128], strides = [1, 1]} : vector<256x256xf32> to vector<256x128xf32>
    %cst_13 = arith.constant 0.000000e+00 : f32
    %32 = vector.broadcast %cst_13 : f32 to vector<256x128xf32>
    %33 = arith.maximumf %31, %32 : vector<256x128xf32>
    %34 = vector.extract_strided_slice %30 {offsets = [0, 128], sizes = [256, 128], strides = [1, 1]} : vector<256x256xf32> to vector<256x128xf32>
    %35 = arith.negf %34 : vector<256x128xf32>
    %36 = math.exp %35 : vector<256x128xf32>
    %cst_14 = arith.constant 1.000000e+00 : f32
    %37 = vector.broadcast %cst_14 : f32 to vector<256x128xf32>
    %38 = arith.addf %37, %36 : vector<256x128xf32>
    %39 = arith.divf %37, %38 : vector<256x128xf32>
    %40 = arith.subf %33, %21 : vector<256x128xf32>
    %41 = arith.mulf %39, %40 : vector<256x128xf32>
    %42 = arith.addf %21, %41 : vector<256x128xf32>
    %c0_15 = arith.constant 0 : index
    %c0_16 = arith.constant 0 : index
    %43 = vector.load %arg4[%c0_15, %c0_16] : memref<256x128xf32, #tpu.memory_space<vmem>>, vector<256x128xf32>
    tpu.vector_store %arg4[%c0_15, %c0_16], %42 {strides = array<i32>} : memref<256x128xf32, #tpu.memory_space<vmem>>, vector<256x128xf32>,
    return
  }
  func.func @transform_0(%arg0: i32) -> (i32, i32) {
    %c0_i32 = arith.constant 0 : i32
    %c0_i32_0 = arith.constant 0 : i32
    return %arg0, %c0_i32 : i32, i32
  }
  func.func @transform_1(%arg0: i32) -> (i32, i32, i32) {
    %c0_i32 = arith.constant 0 : i32
    %c0_i32_0 = arith.constant 0 : i32
    %c0_i32_1 = arith.constant 0 : i32
    %c0_i32_2 = arith.constant 0 : i32
    return %c0_i32, %c0_i32_0, %c0_i32_1 : i32, i32, i32
  }
  func.func @transform_2(%arg0: i32) -> (i32, i32) {
    %c0_i32 = arith.constant 0 : i32
    %c0_i32_0 = arith.constant 0 : i32
    %c0_i32_1 = arith.constant 0 : i32
    return %c0_i32, %c0_i32_0 : i32, i32
  }
  func.func @transform_3(%arg0: i32) -> (i32, i32) {
    %c0_i32 = arith.constant 0 : i32
    %c0_i32_0 = arith.constant 0 : i32
    return %arg0, %c0_i32 : i32, i32
  }
}

</mosaic_0001>

<bundles_post_ra>
// kernel: tpu_custom_call.1
= control target key start
LH: loop header
LB: loop body
LE: loop exit
PB: predicated region body
PF: predicated region fallthrough
CT: control target
= control target key end

     0   :  { %8 = vsyncpa [#allocation3], 0  ;;  %s3213_s0 = inlined_call_operand.hbm [shape: f32[512,128], index: 0, kind: input, shape index: {}]   ;;  %s3214_s1 = inlined_call_operand.hbm [shape: bf16[2,128,256], index: 1, kind: input, shape index: {}]   ;;  %s3215_s2 = inlined_call_operand.vmem [shape: f32[2,256], index: 2, kind: input, shape index: {}]   ;;  %s3216_s3 = inlined_call_operand.hbm [shape: f32[512,128], index: 3, kind: output, shape index: {}]  }
   0x1   :  { %10 = vsyncpa [#allocation3 + $0x1], 0 }
   0x2   :  { %11 = vsyncpa [#allocation6], 0 }
   0x3   :  { %12 = vsyncpa [#allocation4], 0 }
   0x4   :  { %14 = vsyncpa [#allocation4 + $0x1], 0  ;;  %s2283_s12 = smov 0   ;;  %s2285_s13 = smov 0  }
   0x5   :  { %s2287_s14 = smov 0   ;;  %s2289_s15 = smov 0  }
   0x6 LB: > { %s2304_s16 = sadd.s32 4294967295, %s2253_s15   ;;  %s1644_s17 = sadd.s32 4294967294, %s2253_s15   ;;  %s2253_s15 = sphi %s2289_s15, %s3236_s15   ;;  %s2249_s14 = sphi %s2287_s14, %s3235_s14   ;;  %s2245_s13 = sphi %s2285_s13, %s3234_s13   ;;  %s2241_s12 = sphi %s2283_s12, %s3233_s12  }
   0x7   : > { %p40_p0 = scmp.ne.s32.totalorder %s2245_s13, %s2241_s12  ;;  %p3217_p1 = scmp.eq.s32.totalorder %s2304_s16, 0 }
   0x8   : > { %p112_p3 = scmp.eq.s32.totalorder %s1644_s17, 1  ;;  %p1645_p5 = scmp.ge.s32.totalorder %s2253_s15, 1 }
   0x9   : > { %p2313_p4 = por %p3217_p1, %p40_p0  ;;  %p119_p7 = scmp.lt.s32.totalorder %s2253_s15, 3 }
   0xa   : > { %p2318_p6 = por %p112_p3, %p40_p0  ;;  %s2255_s21 = smov [#allocation5]  }
   0xb   : > { %s3220_s18 = scalar_select %p2313_p4, 1, 0 }
   0xc   : > { %s3221_s19 = scalar_select %p2318_p6, 1, 0 }
   0xd   : > { %p2323_p8 = pnand %p1645_p5, %p119_p7  ;;  %s131_s22 = sshll.u32 %s2255_s21, 4  ;;  %s2327_s22 = int_to_ptr.vmem [resolvable:$true] %s131_s22 }
   0xe   : > { %s2339_s24 = sadd.s32 1, %s2253_s15   ;;  %s27_s25 = sadd.s32 1, %s2249_s14 }
   0xf   : > { %s3222_s20 = scalar_select %p2323_p8, 1, 0 }
  0x10   : > { %p1767_p9 = pneg %p2323_p8  ;;  %s24_s26 = ssub.s32 %s2253_s15, %s2339_s24 }
  0x11   : > { %s2125_s29 = scalar_lea.hbm %s3214_s1, 4096 }
  0x12   : > { %p2334_p11 = pnand %p1767_p9, %p3217_p1  ;;  %p2126_p12 = scmp.ne.s32.totalorder %s3214_s1, %s2125_s29 }
  0x13   : > { %p2132_p5 = scmp.lt.u32.totalorder %s2125_s29, %s3214_s1 }
  0x14   : > { %p2127_p13 = pneg %p2334_p11 }
  0x16   : > { %p2128_p0 = pnand %p2127_p13, %p2126_p12 }
  0x18   : > { %p2129_p3 = pneg %p2128_p0 }
  0x1a   : > { %p2134_p7 = pnand %p2132_p5, %p2129_p3 }
  0x1c   : > { %2137 = shalt.err (!%p2134_p7)
}
  0x1d   : > { %s2138_s7 = scalar_lea.vmem %s2327_s22, 4096  ;;  %p2146_p2 = scmp.lt.s32.totalorder %s2327_s22, %s2327_s22 }
  0x1e   : > { %p2139_p9 = scmp.ne.s32.totalorder %s2327_s22, %s2138_s7  ;;  %p2147_p6 = scmp.lt.s32.totalorder %s2138_s7, %s2138_s7 }
  0x20   : > { %p2141_p10 = pnand %p2139_p9, %p2127_p13  ;;  %p2148_p4 = por %p2147_p6, %p2146_p2 }
  0x22   : > { %p2142_p1 = pneg %p2141_p10 }
  0x24   : > { %p2149_p8 = pnand %p2148_p4, %p2142_p1 }
  0x26   : > { %2152 = shalt.err (!%p2149_p8)
}
  0x27   : > { %s2256_s8 = smov 128   ;;  %s2257_s9 = smov 8  }
  0x28   : > { %1770 = dma.hbm_to_vmem [thread:$0]  (!%p2334_p11), %s3214_s1, 4096, %s2327_s22, [#allocation6], %s2256_s8, %s2256_s8, %s2257_s9  }
  0x29   : > { %p25_p1 = scmp.eq.s32.totalorder %s24_s26, 0  ;;  %p34_p2 = scmp.ne.s32.totalorder %s2249_s14, %s2245_s13 }
  0x2a   : > { %p35_p4 = scmp.eq.s32.totalorder %s2253_s15, 0  ;;  %p1780_p6 = scmp.lt.s32.totalorder %s2253_s15, 2 }
  0x2b   : > { %s2373_s17 = scalar_select %p25_p1, %s2249_s14, %s27_s25  }
  0x2c   : > { %p36_p8 = por %p35_p4, %p34_p2  ;;  %p3224_p10 = scmp.eq.s32.totalorder %s2304_s16, 1 }
  0x2d   : > { %s148_s23 = sand.u32 1, %s2249_s14   ;;  %s1757_s27 = sshll.u32 %s2253_s15, 12 }
  0x2e   : > { %p2377_p12 = por %p3224_p10, %p34_p2  ;;  %s1648_s28 = sshll.u32 %s148_s23, 8 }
  0x2f   : > { %s2386_s4 = scalar_lea.hbm %s3213_s0, %s1757_s27  ;;  %s152_s22 = scalar_lea.vmem [#allocation2], %s1648_s28 }
  0x30   : > { %s159_s25 = sshll.u32 %s152_s22, 4  ;;  %p2388_p11 = pnand %p1780_p6, %p36_p8  ;;  %s2392_s25 = int_to_ptr.vmem [resolvable:$true] %s159_s25 }
  0x31   : > { %s2394_s5 = scalar_lea.sflag [#allocation3], %s148_s23  ;;  %s2153_s6 = scalar_lea.hbm %s2386_s4, 4096 }
  0x32   : > { %p2154_p13 = scmp.ne.s32.totalorder %s2386_s4, %s2153_s6  ;;  %p2155_p0 = pneg %p2388_p11 }
  0x33   : > { %s2158_s11 = scalar_lea.hbm %s3213_s0, 8192  ;;  %p2159_p7 = scmp.lt.u32.totalorder %s2386_s4, %s3213_s0 }
  0x34   : > { %p2156_p3 = pnand %p2155_p0, %p2154_p13  ;;  %p2160_p9 = scmp.lt.u32.totalorder %s2158_s11, %s2153_s6 }
  0x35   : > { %p2162_p2 = scmp.lt.u32.totalorder %s2153_s6, %s2386_s4 }
  0x36   : > { %p2157_p5 = pneg %p2156_p3  ;;  %p2161_p1 = por %p2160_p9, %p2159_p7 }
  0x38   : > { %p2163_p4 = por %p2162_p2, %p2161_p1 }
  0x3a   : > { %p2164_p6 = pnand %p2163_p4, %p2157_p5 }
  0x3c   : > { %2167 = shalt.err (!%p2164_p6)
}
  0x3d   : > { %s2168_s23 = scalar_lea.vmem %s2392_s25, 4096  ;;  %s2258_s29 = smov [#allocation2]  }
  0x3e   : > { %p2169_p8 = scmp.ne.s32.totalorder %s2392_s25, %s2168_s23  ;;  %s2173_s30 = sshll.u32 %s2258_s29, 4  ;;  %s2174_s30 = int_to_ptr.vmem [resolvable:$false] %s2173_s30 }
  0x3f   : > { %s2175_s22 = scalar_lea.vmem %s2174_s30, 8192  ;;  %p2176_p3 = scmp.lt.s32.totalorder %s2392_s25, %s2174_s30 }
  0x40   : > { %p2171_p10 = pnand %p2169_p8, %p2155_p0  ;;  %p2177_p7 = scmp.lt.s32.totalorder %s2175_s22, %s2168_s23 }
  0x42   : > { %p2172_p13 = pneg %p2171_p10  ;;  %p2178_p9 = por %p2177_p7, %p2176_p3 }
  0x44   : > { %p2179_p1 = pnand %p2178_p9, %p2172_p13 }
  0x46   : > { %2182 = shalt.err (!%p2179_p1)
}
  0x47   : > { %1774 = dma.hbm_to_vmem [thread:$0]  (!%p2388_p11), %s2386_s4, 4096, %s2392_s25, %s2394_s5, %s2256_s8, %s2256_s8, %s2257_s9  }
  0x48   : > { %p3227_p0 = scmp.ne.s32.totalorder %s3222_s20, 0 }
  0x49   : > { %s2428_s6 = sand.u32 (!%p3227_p0), 1, %s2245_s13   ;;  %p3228_p5 = scmp.ne.s32.totalorder (!%p3227_p0), %s3220_s18, 0 }
  0x4a   : > { %171 = sbr.rel (%p3227_p0) target bundleno = 750 (0x2ee), region = 32  ;;  %s1652_s7 = sshll.u32 (!%p3227_p0), %s2428_s6, 8 }
  0x4b   : > { %s174_s10 = scalar_lea.sflag (!%p3227_p0), [#allocation3], %s2428_s6  ;;  %s2434_s26 = scalar_lea.vmem (!%p3227_p0), [#allocation2], %s1652_s7 }
  0x51   : > { %2228 = dma.done.wait (%p3228_p5), %s174_s10, 4096  }
  0x52   : > { %2230 = vsyncadd (%p3228_p5), %s174_s10, 4294963200  ;;  %p3229_p11 = scmp.eq.s32.totalorder %s2304_s16, 0 }
  0x54   : > { %2232 = dma.done.wait (%p3229_p11), [#allocation6], 4096   ;;  %p3230_p2 = pmov %p3229_p11 }
  0x55   : > { %v2259_v0 = vmov 0   ;;  %v1821_v1 = vld [vmem:[#allocation5 + $0x4] ss:$8 sps:$4 sm:$0xff]   ;;  %v1823_v2 = vld [vmem:[#allocation5] ss:$8 sps:$4 sm:$0xff]   ;;  %v2456_v20 = vld [vmem:[%s2434_s26 + $0x10] sm:$0xff] }
  0x56   : > { %2234 = vsyncadd (%p3230_p2), [#allocation6], 4294963200  ;;  %395 = vmatprep.mubr.bf16.mxu0 %v2259_v0  ;;  %1034 = vmatprep.mubr.bf16.mxu1 %v2259_v0  ;;  %v1824_v3 = vld [vmem:[#allocation5 + $0x14] ss:$8 sps:$4 sm:$0xff]   ;;  %v1826_v4 = vld [vmem:[#allocation5 + $0x10] ss:$8 sps:$4 sm:$0xff]  }
  0x57   : > { %363 = vmatprep.subr.bf16.mxu0 %v1821_v1  ;;  %v1827_v5 = vld [vmem:[#allocation5 + $0x24] ss:$8 sps:$4 sm:$0xff]   ;;  %v1829_v6 = vld [vmem:[#allocation5 + $0x20] ss:$8 sps:$4 sm:$0xff]   ;;  %v1830_v7 = vld [vmem:[#allocation5 + $0x34] ss:$8 sps:$4 sm:$0xff]  }
  0x58   : > { %364 = vmatpush1.bf16.msra.mxu0 %v1823_v2  ;;  %v1832_v8 = vld [vmem:[#allocation5 + $0x30] ss:$8 sps:$4 sm:$0xff]   ;;  %v1833_v9 = vld [vmem:[#allocation5 + $0x44] ss:$8 sps:$4 sm:$0xff]   ;;  %v1835_v10 = vld [vmem:[#allocation5 + $0x40] ss:$8 sps:$4 sm:$0xff]  }
  0x59   : > { %365 = vmatprep.subr.bf16.mxu0 %v1824_v3  ;;  %v1836_v11 = vld [vmem:[#allocation5 + $0x54] ss:$8 sps:$4 sm:$0xff]   ;;  %v1838_v12 = vld [vmem:[#allocation5 + $0x50] ss:$8 sps:$4 sm:$0xff]   ;;  %v1839_v13 = vld [vmem:[#allocation5 + $0x64] ss:$8 sps:$4 sm:$0xff]  }
  0x5a   : > { %v1841_v14 = vld [vmem:[#allocation5 + $0x60] ss:$8 sps:$4 sm:$0xff]   ;;  %v1842_v15 = vld [vmem:[#allocation5 + $0x74] ss:$8 sps:$4 sm:$0xff]   ;;  %v1844_v16 = vld [vmem:[#allocation5 + $0x70] ss:$8 sps:$4 sm:$0xff]  }
  0x5b   : > { %v2447_v17 = vld [vmem:[%s2434_s26] sm:$0xff]  ;;  %v2450_v18 = vld [vmem:[%s2434_s26 + $0x8] sm:$0xff]  ;;  %v2459_v21 = vld [vmem:[%s2434_s26 + $0x18] sm:$0xff]  ;;  %s2949_s4 = scalar_lea.vmem [#allocation7], %s1652_s7  ;;  %s1758_s25 = sshll.u32 %s2304_s16, 12 }
  0x5c   : > { %366 = vmatpush1.bf16.msra.mxu0 %v1826_v4  ;;  %v239_v19 = vpack.c.bf16 %v2450_v18, %v2447_v17  ;;  %v240_v22 = vpack.c.bf16 %v2459_v21, %v2456_v20  ;;  %v2465_v23 = vld [vmem:[%s2434_s26 + $0x20] sm:$0xff]  ;;  %v2468_v24 = vld [vmem:[%s2434_s26 + $0x28] sm:$0xff]  ;;  %v2474_v26 = vld [vmem:[%s2434_s26 + $0x30] sm:$0xff]  ;;  %s1561_s5 = sshll.u32 %s2949_s4, 4  ;;  %s3164_s28 = scalar_lea.hbm %s3216_s3, %s1758_s25  ;;  %s3166_s5 = int_to_ptr.vmem [resolvable:$true] %s1561_s5 }
  0x5d   : > { %367 = vmatprep.subr.bf16.mxu0 %v1827_v5  ;;  %v241_v25 = vpack.c.bf16 %v2468_v24, %v2465_v23  ;;  %v2477_v27 = vld [vmem:[%s2434_s26 + $0x38] sm:$0xff]  ;;  %v2483_v29 = vld [vmem:[%s2434_s26 + $0x40] sm:$0xff]  ;;  %v2486_v30 = vld [vmem:[%s2434_s26 + $0x48] sm:$0xff]  ;;  %s1548_s16 = scalar_lea.sflag [#allocation4], %s2428_s6  ;;  %s2183_s23 = scalar_lea.vmem %s3166_s5, 4096 }
  0x5e   : > { %v242_v28 = vpack.c.bf16 %v2477_v27, %v2474_v26  ;;  %v243_v31 = vpack.c.bf16 %v2486_v30, %v2483_v29  ;;  %v2492_v32 = vld [vmem:[%s2434_s26 + $0x50] sm:$0xff]  ;;  %v2495_v33 = vld [vmem:[%s2434_s26 + $0x58] sm:$0xff]  ;;  %v2501_v35 = vld [vmem:[%s2434_s26 + $0x60] sm:$0xff]  ;;  %p2184_p4 = scmp.ne.s32.totalorder %s3166_s5, %s2183_s23  ;;  %s2260_s29 = smov [#allocation7]  }
  0x5f   : > { %v244_v34 = vpack.c.bf16 %v2495_v33, %v2492_v32  ;;  %v2504_v36 = vld [vmem:[%s2434_s26 + $0x68] sm:$0xff]  ;;  %v2510_v38 = vld [vmem:[%s2434_s26 + $0x70] sm:$0xff]  ;;  %v2513_v39 = vld [vmem:[%s2434_s26 + $0x78] sm:$0xff]  ;;  %s2187_s30 = sshll.u32 %s2260_s29, 4  ;;  %s2188_s30 = int_to_ptr.vmem [resolvable:$false] %s2187_s30 }
  0x60   : > { %368 = vmatpush1.bf16.msra.mxu0 %v1829_v6  ;;  %v245_v37 = vpack.c.bf16 %v2504_v36, %v2501_v35  ;;  %v246_v40 = vpack.c.bf16 %v2513_v39, %v2510_v38  ;;  %v2519_v41 = vld [vmem:[%s2434_s26 + $0x80] sm:$0xff]  ;;  %v2522_v42 = vld [vmem:[%s2434_s26 + $0x88] sm:$0xff]  ;;  %v2528_v44 = vld [vmem:[%s2434_s26 + $0x90] sm:$0xff]  ;;  %p2185_p6 = pnand %p2184_p4, %p2377_p12  ;;  %s2189_s22 = scalar_lea.vmem %s2188_s30, 8192 }
  0x61   : > { %369 = vmatprep.subr.bf16.mxu0 %v1830_v7  ;;  %v247_v43 = vpack.c.bf16 %v2522_v42, %v2519_v41  ;;  %v2531_v45 = vld [vmem:[%s2434_s26 + $0x98] sm:$0xff]  ;;  %v2537_v47 = vld [vmem:[%s2434_s26 + $0xa0] sm:$0xff]  ;;  %v2540_v48 = vld [vmem:[%s2434_s26 + $0xa8] sm:$0xff]  ;;  %p2190_p10 = scmp.lt.s32.totalorder %s3166_s5, %s2188_s30  ;;  %p2191_p13 = scmp.lt.s32.totalorder %s2189_s22, %s2183_s23 }
  0x62   : > { %v248_v46 = vpack.c.bf16 %v2531_v45, %v2528_v44  ;;  %v249_v49 = vpack.c.bf16 %v2540_v48, %v2537_v47  ;;  %v2546_v50 = vld [vmem:[%s2434_s26 + $0xb0] sm:$0xff]  ;;  %v2549_v51 = vld [vmem:[%s2434_s26 + $0xb8] sm:$0xff]  ;;  %v1845_v53 = vld [vmem:[#allocation5 + $0x84] ss:$8 sps:$4 sm:$0xff]   ;;  %p2186_p8 = pneg %p2185_p6 }
  0x63   : > { %v250_v52 = vpack.c.bf16 %v2549_v51, %v2546_v50  ;;  %v1847_v54 = vld [vmem:[#allocation5 + $0x80] ss:$8 sps:$4 sm:$0xff]   ;;  %1002 = vmatprep.subr.bf16.mxu1 %v1845_v53  ;;  %v1848_v57 = vld [vmem:[#allocation5 + $0x94] ss:$8 sps:$4 sm:$0xff]   ;;  %v1850_v59 = vld [vmem:[#allocation5 + $0x90] ss:$8 sps:$4 sm:$0xff]   ;;  %p2192_p3 = por %p2191_p13, %p2190_p10 }
  0x64   : > { %370 = vmatpush1.bf16.msra.mxu0 %v1832_v8  ;;  %v2555_v55 = vld [vmem:[%s2434_s26 + $0xc0] sm:$0xff]  ;;  %v2558_v56 = vld [vmem:[%s2434_s26 + $0xc8] sm:$0xff]  ;;  %1003 = vmatpush1.bf16.msra.mxu1 %v1847_v54  ;;  %v2564_v62 = vld [vmem:[%s2434_s26 + $0xd0] sm:$0xff] }
  0x65   : > { %371 = vmatprep.subr.bf16.mxu0 %v1833_v9  ;;  %v251_v58 = vpack.c.bf16 %v2558_v56, %v2555_v55  ;;  %1004 = vmatprep.subr.bf16.mxu1 %v1848_v57  ;;  %v1851_v60 = vld [vmem:[#allocation5 + $0xa4] ss:$8 sps:$4 sm:$0xff]   ;;  %v1853_v61 = vld [vmem:[#allocation5 + $0xa0] ss:$8 sps:$4 sm:$0xff]   ;;  %v2567_v63 = vld [vmem:[%s2434_s26 + $0xd8] sm:$0xff]  ;;  %p2193_p7 = pnand %p2192_p3, %p2186_p8 }
  0x66   : > { %v1854_v1 = vld [vmem:[#allocation5 + $0xb4] ss:$8 sps:$4 sm:$0xff]   ;;  %v252_v2 = vpack.c.bf16 %v2567_v63, %v2564_v62  ;;  %v1856_v3 = vld [vmem:[#allocation5 + $0xb0] ss:$8 sps:$4 sm:$0xff]   ;;  %v1857_v4 = vld [vmem:[#allocation5 + $0xc4] ss:$8 sps:$4 sm:$0xff]  }
  0x67   : > { %v1859_v5 = vld [vmem:[#allocation5 + $0xc0] ss:$8 sps:$4 sm:$0xff]   ;;  %v1860_v8 = vld [vmem:[#allocation5 + $0xd4] ss:$8 sps:$4 sm:$0xff]  }
  0x68   : > { %372 = vmatpush1.bf16.msra.mxu0 %v1835_v10  ;;  %1005 = vmatpush1.bf16.msra.mxu1 %v1850_v59  ;;  %v2573_v6 = vld [vmem:[%s2434_s26 + $0xe0] sm:$0xff]  ;;  %v2576_v7 = vld [vmem:[%s2434_s26 + $0xe8] sm:$0xff]  ;;  %v1862_v10 = vld [vmem:[#allocation5 + $0xd0] ss:$8 sps:$4 sm:$0xff]  }
  0x69   : > { %373 = vmatprep.subr.bf16.mxu0 %v1836_v11  ;;  %1006 = vmatprep.subr.bf16.mxu1 %v1851_v60  ;;  %v253_v9 = vpack.c.bf16 %v2576_v7, %v2573_v6  ;;  %v1863_v11 = vld [vmem:[#allocation5 + $0xe4] ss:$8 sps:$4 sm:$0xff]  }
  0x6c   : > { %374 = vmatpush1.bf16.msra.mxu0 %v1838_v12  ;;  %1007 = vmatpush1.bf16.msra.mxu1 %v1853_v61  ;;  %v1865_v12 = vld [vmem:[#allocation5 + $0xe0] ss:$8 sps:$4 sm:$0xff]  }
  0x6d   : > { %375 = vmatprep.subr.bf16.mxu0 %v1839_v13  ;;  %1008 = vmatprep.subr.bf16.mxu1 %v1854_v1  ;;  %v2582_v13 = vld [vmem:[%s2434_s26 + $0xf0] sm:$0xff] }
  0x70   : > { %376 = vmatpush1.bf16.msra.mxu0 %v1841_v14  ;;  %1009 = vmatpush1.bf16.msra.mxu1 %v1856_v3  ;;  %v2585_v14 = vld [vmem:[%s2434_s26 + $0xf8] sm:$0xff] }
  0x71   : > { %377 = vmatprep.subr.bf16.mxu0 %v1842_v15  ;;  %1010 = vmatprep.subr.bf16.mxu1 %v1857_v4  ;;  %v1866_v15 = vld [vmem:[#allocation5 + $0xf4] ss:$8 sps:$4 sm:$0xff]  }
  0x74   : > { %378 = vmatpush1.bf16.msra.mxu0 %v1844_v16  ;;  %1011 = vmatpush1.bf16.msra.mxu1 %v1859_v5  ;;  %v254_v16 = vpack.c.bf16 %v2585_v14, %v2582_v13 }
  0x75   : > { %1012 = vmatprep.subr.bf16.mxu1 %v1860_v8 }
  0x77   : > { %396 = vmatmul.mubr.bf16.vlgmr.msra.gmra.mrb[0].mxu0 %v239_v19  ;;  %v1868_v19 = vld [vmem:[#allocation5 + $0xf0] ss:$8 sps:$4 sm:$0xff]  }
  0x78   : > { %405 = vmatprep.mubr.bf16.mxu0 %v2259_v0  ;;  %1013 = vmatpush1.bf16.msra.mxu1 %v1862_v10 }
  0x79   : > { %1014 = vmatprep.subr.bf16.mxu1 %v1863_v11 }
  0x7c   : > { %1015 = vmatpush1.bf16.msra.mxu1 %v1865_v12 }
  0x7d   : > { %1016 = vmatprep.subr.bf16.mxu1 %v1866_v15 }
  0x7f   : > { %406 = vmatmul.mubr.bf16.gmra.mrb[4].mxu0 %v240_v22  ;;  %v273_v22 = vlaneseq }
  0x80   : > { %415 = vmatprep.mubr.bf16.mxu0 %v2259_v0  ;;  %1017 = vmatpush1.bf16.msra.mxu1 %v1868_v19 }
  0x87   : > { %416 = vmatmul.mubr.bf16.gmra.mrb[8].mxu0 %v241_v25  ;;  %v2589_v25 = vshrl.u32 %v273_v22, 7 }
  0x88   : > { %425 = vmatprep.mubr.bf16.mxu0 %v2259_v0 }
  0x89   : > { %v275_v1 = vsub.s32 0, %v2589_v25 }
  0x8f   : > { %426 = vmatmul.mubr.bf16.gmra.mrb[12].mxu0 %v242_v28  ;;  %v279_v28 = vsub.s32 1, %v2589_v25 }
  0x90   : > { %435 = vmatprep.mubr.bf16.mxu0 %v2259_v0 }
  0x97   : > { %436 = vmatmul.mubr.bf16.gmra.mrb[16].mxu0 %v243_v31  ;;  %v271_v31 = vld [vmem:[%s3215_s2] ss:$2 sm:$0x3] }
  0x98   : > { %445 = vmatprep.mubr.bf16.mxu0 %v2259_v0  ;;  %v2606_v8 = vrot.slane %v271_v31, %v275_v1 }
  0x9f   : > { %446 = vmatmul.mubr.bf16.gmra.mrb[20].mxu0 %v244_v34  ;;  %v2597_v34 = vrot.slane %v271_v31, %v279_v28 }
  0xa0   : > { %455 = vmatprep.mubr.bf16.mxu0 %v2259_v0 }
  0xa7   : > { %456 = vmatmul.mubr.bf16.gmra.mrb[24].mxu0 %v245_v37 }
  0xa8   : > { %465 = vmatprep.mubr.bf16.mxu0 %v2259_v0 }
  0xaf   : > { %466 = vmatmul.mubr.bf16.gmra.mrb[28].mxu0 %v246_v40 }
  0xb0   : > { %475 = vmatprep.mubr.bf16.mxu0 %v2259_v0 }
  0xb7   : > { %476 = vmatmul.mubr.bf16.gmra.mrb[32].mxu0 %v247_v43 }
  0xb8   : > { %485 = vmatprep.mubr.bf16.mxu0 %v2259_v0 }
  0xbf   : > { %486 = vmatmul.mubr.bf16.gmra.mrb[36].mxu0 %v248_v46 }
  0xc0   : > { %495 = vmatprep.mubr.bf16.mxu0 %v2259_v0 }
  0xc7   : > { %496 = vmatmul.mubr.bf16.gmra.mrb[40].mxu0 %v249_v49 }
  0xc8   : > { %505 = vmatprep.mubr.bf16.mxu0 %v2259_v0 }
  0xcf   : > { %506 = vmatmul.mubr.bf16.gmra.mrb[44].mxu0 %v250_v52 }
  0xd0   : > { %515 = vmatprep.mubr.bf16.mxu0 %v2259_v0 }
  0xd7   : > { %516 = vmatmul.mubr.bf16.gmra.mrb[48].mxu0 %v251_v58 }
  0xd8   : > { %525 = vmatprep.mubr.bf16.mxu0 %v2259_v0 }
  0xdf   : > { %526 = vmatmul.mubr.bf16.gmra.mrb[52].mxu0 %v252_v2 }
  0xe0   : > { %535 = vmatprep.mubr.bf16.mxu0 %v2259_v0 }
  0xe7   : > { %536 = vmatmul.mubr.bf16.gmra.mrb[56].mxu0 %v253_v9 }
  0xe8   : > { %545 = vmatprep.mubr.bf16.mxu0 %v2259_v0 }
  0xef   : > { %546 = vmatmul.mubr.bf16.gmra.mrb[60].mxu0 %v254_v16 }
 0x14a   : > { %v397_v37 = vpop.f32.mrb[0].mxu0 }
 0x14b   : > { %v399_v40 = vpop.f32.mrb[1].mxu0 }
 0x14c   : > { %v400_v43 = vadd.f32 %v399_v40, %v2597_v34  ;;  %v401_v46 = vpop.f32.mrb[2].mxu0  ;;  %v398_v40 = vadd.f32 %v397_v37, %v2606_v8 }
 0x14d   : > { %v403_v49 = vpop.f32.mrb[3].mxu0 }
 0x14e   : > { %v1671_v52 = vmul.f32 -1.442695, %v400_v43  ;;  %v404_v53 = vadd.f32 %v403_v49, %v2597_v34 }
 0x150   : > { %1869 = vpow2.f32 %v1671_v52  ;;  %v1672_v54 = vmul.f32 -1.442695, %v404_v53  ;;  %v402_v52 = vadd.f32 %v401_v46, %v2606_v8 }
 0x152   : > { %1871 = vpow2.f32 %v1672_v54  ;;  %v407_v57 = vpop.f32.mrb[4].mxu0  ;;  %v556_v54 = vmax.f32 %v398_v40, 0.0 }
 0x153   : > { %v409_v58 = vpop.f32.mrb[5].mxu0 }
 0x154   : > { %v410_v59 = vadd.f32 %v409_v58, %v2597_v34  ;;  %v411_v60 = vpop.f32.mrb[6].mxu0  ;;  %v780_v46 = vsub.f32 %v556_v54, %v2447_v17 }
 0x155   : > { %v413_v61 = vpop.f32.mrb[7].mxu0  ;;  %v412_v40 = vadd.f32 %v411_v60, %v2606_v8 }
 0x156   : > { %v1673_v2 = vmul.f32 -1.442695, %v410_v59  ;;  %v414_v3 = vadd.f32 %v413_v61, %v2597_v34  ;;  %v557_v59 = vmax.f32 %v402_v52, 0.0 }
 0x158   : > { %1873 = vpow2.f32 %v1673_v2  ;;  %v1674_v4 = vmul.f32 -1.442695, %v414_v3 }
 0x15a   : > { %v1870_v5 = vpop.eup %1869  ;;  %1875 = vpow2.f32 %v1674_v4  ;;  %v417_v9 = vpop.f32.mrb[8].mxu0 }
 0x15b   : > { %v684_v10 = vadd.f32 1.0, %v1870_v5  ;;  %v419_v11 = vpop.f32.mrb[9].mxu0 }
 0x15c   : > { %v1872_v12 = vpop.eup %1871  ;;  %v420_v15 = vadd.f32 %v419_v11, %v2597_v34  ;;  %v421_v16 = vpop.f32.mrb[10].mxu0  ;;  %v408_v11 = vadd.f32 %v407_v57, %v2606_v8 }
 0x15d   : > { %1877 = vrcp.f32 %v684_v10  ;;  %v685_v19 = vadd.f32 1.0, %v1872_v12  ;;  %v423_v22 = vpop.f32.mrb[11].mxu0 }
 0x15e   : > { %v1675_v43 = vmul.f32 -1.442695, %v420_v15  ;;  %v424_v49 = vadd.f32 %v423_v22, %v2597_v34  ;;  %v781_v22 = vsub.f32 %v557_v59, %v2450_v18 }
 0x15f   : > { %1879 = vrcp.f32 %v685_v19 }
 0x160   : > { %1881 = vpow2.f32 %v1675_v43  ;;  %v1676_v31 = vmul.f32 -1.442695, %v424_v49 }
 0x162   : > { %v1874_v53 = vpop.eup %1873  ;;  %1883 = vpow2.f32 %v1676_v31  ;;  %v2612_v58 = vpop.f32.mrb[12].mxu0 }
 0x163   : > { %v686_v61 = vadd.f32 1.0, %v1874_v53  ;;  %v429_v2 = vpop.f32.mrb[13].mxu0  ;;  %v558_v53 = vmax.f32 %v408_v11, 0.0 }
 0x164   : > { %v1876_v3 = vpop.eup %1875  ;;  %v430_v4 = vadd.f32 %v429_v2, %v2597_v34  ;;  %v2615_v37 = vpop.f32.mrb[14].mxu0 }
 0x165   : > { %1885 = vrcp.f32 %v686_v61  ;;  %v687_v5 = vadd.f32 1.0, %v1876_v3  ;;  %v433_v10 = vpop.f32.mrb[15].mxu0 }
 0x166   : > { %v1677_v12 = vmul.f32 -1.442695, %v430_v4  ;;  %v434_v15 = vadd.f32 %v433_v10, %v2597_v34  ;;  %v559_v4 = vmax.f32 %v412_v40, 0.0 }
 0x167   : > { %v1878_v19 = vpop.eup %1877  ;;  %1887 = vrcp.f32 %v687_v5 }
 0x168   : > { %1889 = vpow2.f32 %v1677_v12  ;;  %v1678_v43 = vmul.f32 -1.442695, %v434_v15  ;;  %v812_v49 = vmul.f32 %v1878_v19, %v780_v46  ;;  %v418_v46 = vadd.f32 %v417_v9, %v2606_v8 }
 0x169   : > { %v1880_v52 = vpop.eup %1879  ;;  %v782_v15 = vsub.f32 %v558_v53, %v2456_v20 }
 0x16a   : > { %v1882_v31 = vpop.eup %1881  ;;  %1891 = vpow2.f32 %v1678_v43  ;;  %v2622_v61 = vpop.f32.mrb[16].mxu0  ;;  %v813_v54 = vmul.f32 %v1880_v52, %v781_v22  ;;  %v2628_v60 = vadd.f32 %v812_v49, %v2447_v17  ;;  %v422_v17 = vadd.f32 %v421_v16, %v2606_v8 }
 0x16b   : > { %v688_v57 = vadd.f32 1.0, %v1882_v31  ;;  %v439_v2 = vpop.f32.mrb[17].mxu0  ;;  %v560_v31 = vmax.f32 %v418_v46, 0.0 }
 0x16c   : > { %v1884_v3 = vpop.eup %1883  ;;  %v440_v10 = vadd.f32 %v439_v2, %v2597_v34  ;;  %v2625_v59 = vpop.f32.mrb[18].mxu0  ;;  %v2631_v5 = vadd.f32 %v813_v54, %v2450_v18  ;;  %v783_v18 = vsub.f32 %v559_v4, %v2459_v21  ;;  %v561_v2 = vmax.f32 %v422_v17, 0.0 }
 0x16d   : > { %1893 = vrcp.f32 %v688_v57  ;;  %v689_v11 = vadd.f32 1.0, %v1884_v3  ;;  %v443_v12 = vpop.f32.mrb[19].mxu0 }
 0x16e   : > { %v1679_v19 = vmul.f32 -1.442695, %v440_v10  ;;  %v444_v22 = vadd.f32 %v443_v12, %v2597_v34  ;;  %v876_v40 = vpack.c.bf16 %v2631_v5, %v2628_v60 }
 0x16f   : > { %v1886_v43 = vpop.eup %1885  ;;  %1895 = vrcp.f32 %v689_v11 }
 0x170   : > { %1897 = vpow2.f32 %v1679_v19  ;;  %v1680_v49 = vmul.f32 -1.442695, %v444_v22  ;;  %1035 = vmatmul.mubr.bf16.vlgmr.msra.gmra.mrb[0].mxu1 %v876_v40  ;;  %v814_v9 = vmul.f32 %v1886_v43, %v782_v15  ;;  %v784_v15 = vsub.f32 %v560_v31, %v2465_v23 }
 0x171   : > { %v1888_v52 = vpop.eup %1887  ;;  %1044 = vmatprep.mubr.bf16.mxu1 %v2259_v0  ;;  %v428_v40 = vadd.f32 %v2612_v58, %v2606_v8 }
 0x172   : > { %v1890_v53 = vpop.eup %1889  ;;  %1899 = vpow2.f32 %v1680_v49  ;;  %v2641_v54 = vpop.f32.mrb[20].mxu0  ;;  %v815_v57 = vmul.f32 %v1888_v52, %v783_v18  ;;  %v2647_v12 = vadd.f32 %v814_v9, %v2456_v20  ;;  %v785_v20 = vsub.f32 %v561_v2, %v2468_v24 }
 0x173   : > { %v690_v3 = vadd.f32 1.0, %v1890_v53  ;;  %v449_v10 = vpop.f32.mrb[21].mxu0  ;;  %v562_v53 = vmax.f32 %v428_v40, 0.0  ;;  %v438_v40 = vadd.f32 %v2622_v61, %v2606_v8 }
 0x174   : > { %v1892_v16 = vpop.eup %1891  ;;  %v450_v11 = vadd.f32 %v449_v10, %v2597_v34  ;;  %v2644_v4 = vpop.f32.mrb[22].mxu0  ;;  %v2650_v46 = vadd.f32 %v815_v57, %v2459_v21  ;;  %v432_v21 = vadd.f32 %v2615_v37, %v2606_v8 }
 0x175   : > { %1901 = vrcp.f32 %v690_v3  ;;  %v691_v19 = vadd.f32 1.0, %v1892_v16  ;;  %v453_v22 = vpop.f32.mrb[23].mxu0 }
 0x176   : > { %v1681_v43 = vmul.f32 -1.442695, %v450_v11  ;;  %v454_v17 = vadd.f32 %v453_v22, %v2597_v34  ;;  %v877_v18 = vpack.c.bf16 %v2650_v46, %v2647_v12  ;;  %v563_v11 = vmax.f32 %v432_v21, 0.0 }
 0x177   : > { %v1894_v49 = vpop.eup %1893  ;;  %1903 = vrcp.f32 %v691_v19 }
 0x178   : > { %1905 = vpow2.f32 %v1681_v43  ;;  %v1682_v9 = vmul.f32 -1.442695, %v454_v17  ;;  %1045 = vmatmul.mubr.bf16.gmra.mrb[4].mxu1 %v877_v18  ;;  %v816_v52 = vmul.f32 %v1894_v49, %v784_v15  ;;  %v786_v18 = vsub.f32 %v562_v53, %v2474_v26 }
 0x179   : > { %v1896_v31 = vpop.eup %1895  ;;  %1054 = vmatprep.mubr.bf16.mxu1 %v2259_v0 }
 0x17a   : > { %v1898_v58 = vpop.eup %1897  ;;  %1907 = vpow2.f32 %v1682_v9  ;;  %v2662_v57 = vpop.f32.mrb[24].mxu0  ;;  %v817_v3 = vmul.f32 %v1896_v31, %v785_v20  ;;  %v2668_v22 = vadd.f32 %v816_v52, %v2465_v23  ;;  %v442_v23 = vadd.f32 %v2625_v59, %v2606_v8 }
 0x17b   : > { %v692_v10 = vadd.f32 1.0, %v1898_v58  ;;  %v459_v16 = vpop.f32.mrb[25].mxu0  ;;  %v564_v58 = vmax.f32 %v438_v40, 0.0 }
 0x17c   : > { %v1900_v2 = vpop.eup %1899  ;;  %v460_v19 = vadd.f32 %v459_v16, %v2597_v34  ;;  %v2665_v37 = vpop.f32.mrb[26].mxu0  ;;  %v2671_v15 = vadd.f32 %v817_v3, %v2468_v24  ;;  %v787_v24 = vsub.f32 %v563_v11, %v2477_v27  ;;  %v565_v16 = vmax.f32 %v442_v23, 0.0 }
 0x17d   : > { %1909 = vrcp.f32 %v692_v10  ;;  %v693_v43 = vadd.f32 1.0, %v1900_v2  ;;  %v463_v17 = vpop.f32.mrb[27].mxu0 }
 0x17e   : > { %v1683_v49 = vmul.f32 -1.442695, %v460_v19  ;;  %v464_v20 = vadd.f32 %v463_v17, %v2597_v34  ;;  %v878_v21 = vpack.c.bf16 %v2671_v15, %v2668_v22 }
 0x17f   : > { %v1902_v9 = vpop.eup %1901  ;;  %1911 = vrcp.f32 %v693_v43 }
 0x180   : > { %1913 = vpow2.f32 %v1683_v49  ;;  %v1684_v61 = vmul.f32 -1.442695, %v464_v20  ;;  %1055 = vmatmul.mubr.bf16.gmra.mrb[8].mxu1 %v878_v21  ;;  %v818_v52 = vmul.f32 %v1902_v9, %v786_v18  ;;  %v788_v18 = vsub.f32 %v564_v58, %v2483_v29 }
 0x181   : > { %v1904_v31 = vpop.eup %1903  ;;  %1064 = vmatprep.mubr.bf16.mxu1 %v2259_v0  ;;  %v448_v21 = vadd.f32 %v2641_v54, %v2606_v8 }
 0x182   : > { %v1906_v53 = vpop.eup %1905  ;;  %1915 = vpow2.f32 %v1684_v61  ;;  %v2683_v3 = vpop.f32.mrb[28].mxu0  ;;  %v819_v10 = vmul.f32 %v1904_v31, %v787_v24  ;;  %v2689_v17 = vadd.f32 %v818_v52, %v2474_v26  ;;  %v789_v26 = vsub.f32 %v565_v16, %v2486_v30 }
 0x183   : > { %v694_v2 = vadd.f32 1.0, %v1906_v53  ;;  %v469_v19 = vpop.f32.mrb[29].mxu0  ;;  %v566_v53 = vmax.f32 %v448_v21, 0.0  ;;  %v458_v21 = vadd.f32 %v2662_v57, %v2606_v8 }
 0x184   : > { %v1908_v59 = vpop.eup %1907  ;;  %v470_v43 = vadd.f32 %v469_v19, %v2597_v34  ;;  %v2686_v11 = vpop.f32.mrb[30].mxu0  ;;  %v2692_v40 = vadd.f32 %v819_v10, %v2477_v27  ;;  %v452_v27 = vadd.f32 %v2644_v4, %v2606_v8 }
 0x185   : > { %1917 = vrcp.f32 %v694_v2  ;;  %v695_v49 = vadd.f32 1.0, %v1908_v59  ;;  %v473_v20 = vpop.f32.mrb[31].mxu0 }
 0x186   : > { %v1685_v9 = vmul.f32 -1.442695, %v470_v43  ;;  %v474_v23 = vadd.f32 %v473_v20, %v2597_v34  ;;  %v879_v24 = vpack.c.bf16 %v2692_v40, %v2689_v17  ;;  %v567_v43 = vmax.f32 %v452_v27, 0.0 }
 0x187   : > { %v1910_v61 = vpop.eup %1909  ;;  %1919 = vrcp.f32 %v695_v49 }
 0x188   : > { %1921 = vpow2.f32 %v1685_v9  ;;  %v1686_v52 = vmul.f32 -1.442695, %v474_v23  ;;  %1065 = vmatmul.mubr.bf16.gmra.mrb[12].mxu1 %v879_v24  ;;  %v820_v31 = vmul.f32 %v1910_v61, %v788_v18  ;;  %v790_v24 = vsub.f32 %v566_v53, %v2492_v32 }
 0x189   : > { %v1912_v58 = vpop.eup %1911  ;;  %1074 = vmatprep.mubr.bf16.mxu1 %v2259_v0 }
 0x18a   : > { %v1914_v54 = vpop.eup %1913  ;;  %1923 = vpow2.f32 %v1686_v52  ;;  %v2704_v10 = vpop.f32.mrb[32].mxu0  ;;  %v821_v2 = vmul.f32 %v1912_v58, %v789_v26  ;;  %v2710_v20 = vadd.f32 %v820_v31, %v2483_v29  ;;  %v462_v29 = vadd.f32 %v2665_v37, %v2606_v8 }
 0x18b   : > { %v696_v19 = vadd.f32 1.0, %v1914_v54  ;;  %v479_v59 = vpop.f32.mrb[33].mxu0  ;;  %v568_v54 = vmax.f32 %v458_v21, 0.0 }
 0x18c   : > { %v1916_v16 = vpop.eup %1915  ;;  %v480_v49 = vadd.f32 %v479_v59, %v2597_v34  ;;  %v2707_v4 = vpop.f32.mrb[34].mxu0  ;;  %v2713_v18 = vadd.f32 %v821_v2, %v2486_v30  ;;  %v791_v30 = vsub.f32 %v567_v43, %v2495_v33  ;;  %v569_v59 = vmax.f32 %v462_v29, 0.0 }
 0x18d   : > { %1925 = vrcp.f32 %v696_v19  ;;  %v697_v9 = vadd.f32 1.0, %v1916_v16  ;;  %v483_v23 = vpop.f32.mrb[35].mxu0 }
 0x18e   : > { %v1687_v61 = vmul.f32 -1.442695, %v480_v49  ;;  %v484_v26 = vadd.f32 %v483_v23, %v2597_v34  ;;  %v880_v27 = vpack.c.bf16 %v2713_v18, %v2710_v20 }
 0x18f   : > { %v1918_v52 = vpop.eup %1917  ;;  %1927 = vrcp.f32 %v697_v9 }
 0x190   : > { %1929 = vpow2.f32 %v1687_v61  ;;  %v1688_v57 = vmul.f32 -1.442695, %v484_v26  ;;  %1075 = vmatmul.mubr.bf16.gmra.mrb[16].mxu1 %v880_v27  ;;  %v822_v31 = vmul.f32 %v1918_v52, %v790_v24  ;;  %v792_v24 = vsub.f32 %v568_v54, %v2501_v35 }
 0x191   : > { %v1920_v58 = vpop.eup %1919  ;;  %1084 = vmatprep.mubr.bf16.mxu1 %v2259_v0  ;;  %v468_v27 = vadd.f32 %v2683_v3, %v2606_v8 }
 0x192   : > { %v1922_v53 = vpop.eup %1921  ;;  %1931 = vpow2.f32 %v1688_v57  ;;  %v2725_v2 = vpop.f32.mrb[36].mxu0  ;;  %v823_v19 = vmul.f32 %v1920_v58, %v791_v30  ;;  %v2731_v23 = vadd.f32 %v822_v31, %v2492_v32  ;;  %v793_v32 = vsub.f32 %v569_v59, %v2504_v36 }
 0x193   : > { %v698_v16 = vadd.f32 1.0, %v1922_v53  ;;  %v489_v49 = vpop.f32.mrb[37].mxu0  ;;  %v570_v53 = vmax.f32 %v468_v27, 0.0  ;;  %v478_v27 = vadd.f32 %v2704_v10, %v2606_v8 }
 0x194   : > { %v1924_v37 = vpop.eup %1923  ;;  %v490_v9 = vadd.f32 %v489_v49, %v2597_v34  ;;  %v2728_v43 = vpop.f32.mrb[38].mxu0  ;;  %v2734_v21 = vadd.f32 %v823_v19, %v2495_v33  ;;  %v472_v33 = vadd.f32 %v2686_v11, %v2606_v8 }
 0x195   : > { %1933 = vrcp.f32 %v698_v16  ;;  %v699_v61 = vadd.f32 1.0, %v1924_v37  ;;  %v493_v26 = vpop.f32.mrb[39].mxu0 }
 0x196   : > { %v1689_v52 = vmul.f32 -1.442695, %v490_v9  ;;  %v494_v29 = vadd.f32 %v493_v26, %v2597_v34  ;;  %v881_v30 = vpack.c.bf16 %v2734_v21, %v2731_v23  ;;  %v571_v9 = vmax.f32 %v472_v33, 0.0 }
 0x197   : > { %v1926_v57 = vpop.eup %1925  ;;  %1935 = vrcp.f32 %v699_v61 }
 0x198   : > { %1937 = vpow2.f32 %v1689_v52  ;;  %v1690_v31 = vmul.f32 -1.442695, %v494_v29  ;;  %1085 = vmatmul.mubr.bf16.gmra.mrb[20].mxu1 %v881_v30  ;;  %v824_v58 = vmul.f32 %v1926_v57, %v792_v24  ;;  %v794_v30 = vsub.f32 %v570_v53, %v2510_v38 }
 0x199   : > { %v1928_v54 = vpop.eup %1927  ;;  %1094 = vmatprep.mubr.bf16.mxu1 %v2259_v0 }
 0x19a   : > { %v1930_v3 = vpop.eup %1929  ;;  %1939 = vpow2.f32 %v1690_v31  ;;  %v2746_v19 = vpop.f32.mrb[40].mxu0  ;;  %v825_v16 = vmul.f32 %v1928_v54, %v793_v32  ;;  %v2752_v26 = vadd.f32 %v824_v58, %v2501_v35  ;;  %v482_v35 = vadd.f32 %v2707_v4, %v2606_v8 }
 0x19b   : > { %v700_v49 = vadd.f32 1.0, %v1930_v3  ;;  %v499_v37 = vpop.f32.mrb[41].mxu0  ;;  %v572_v3 = vmax.f32 %v478_v27, 0.0 }
 0x19c   : > { %v1932_v59 = vpop.eup %1931  ;;  %v500_v61 = vadd.f32 %v499_v37, %v2597_v34  ;;  %v2749_v11 = vpop.f32.mrb[42].mxu0  ;;  %v2755_v24 = vadd.f32 %v825_v16, %v2504_v36  ;;  %v795_v36 = vsub.f32 %v571_v9, %v2513_v39  ;;  %v573_v37 = vmax.f32 %v482_v35, 0.0 }
 0x19d   : > { %1941 = vrcp.f32 %v700_v49  ;;  %v701_v52 = vadd.f32 1.0, %v1932_v59  ;;  %v503_v29 = vpop.f32.mrb[43].mxu0 }
 0x19e   : > { %v1691_v57 = vmul.f32 -1.442695, %v500_v61  ;;  %v504_v32 = vadd.f32 %v503_v29, %v2597_v34  ;;  %v882_v33 = vpack.c.bf16 %v2755_v24, %v2752_v26 }
 0x19f   : > { %v1934_v31 = vpop.eup %1933  ;;  %1943 = vrcp.f32 %v701_v52 }
 0x1a0   : > { %1945 = vpow2.f32 %v1691_v57  ;;  %v1692_v10 = vmul.f32 -1.442695, %v504_v32  ;;  %1095 = vmatmul.mubr.bf16.gmra.mrb[24].mxu1 %v882_v33  ;;  %v826_v58 = vmul.f32 %v1934_v31, %v794_v30  ;;  %v796_v30 = vsub.f32 %v572_v3, %v2519_v41 }
 0x1a1   : > { %v1936_v54 = vpop.eup %1935  ;;  %1104 = vmatprep.mubr.bf16.mxu1 %v2259_v0  ;;  %v488_v33 = vadd.f32 %v2725_v2, %v2606_v8 }
 0x1a2   : > { %v1938_v53 = vpop.eup %1937  ;;  %1947 = vpow2.f32 %v1692_v10  ;;  %v2767_v16 = vpop.f32.mrb[44].mxu0  ;;  %v827_v49 = vmul.f32 %v1936_v54, %v795_v36  ;;  %v2773_v29 = vadd.f32 %v826_v58, %v2510_v38  ;;  %v797_v38 = vsub.f32 %v573_v37, %v2522_v42 }
 0x1a3   : > { %v702_v59 = vadd.f32 1.0, %v1938_v53  ;;  %v509_v61 = vpop.f32.mrb[45].mxu0  ;;  %v574_v53 = vmax.f32 %v488_v33, 0.0  ;;  %v498_v33 = vadd.f32 %v2746_v19, %v2606_v8 }
 0x1a4   : > { %v1940_v4 = vpop.eup %1939  ;;  %v510_v52 = vadd.f32 %v509_v61, %v2597_v34  ;;  %v2770_v9 = vpop.f32.mrb[46].mxu0  ;;  %v2776_v27 = vadd.f32 %v827_v49, %v2513_v39  ;;  %v492_v39 = vadd.f32 %v2728_v43, %v2606_v8 }
 0x1a5   : > { %1949 = vrcp.f32 %v702_v59  ;;  %v703_v57 = vadd.f32 1.0, %v1940_v4  ;;  %v513_v32 = vpop.f32.mrb[47].mxu0 }
 0x1a6   : > { %v1693_v31 = vmul.f32 -1.442695, %v510_v52  ;;  %v514_v35 = vadd.f32 %v513_v32, %v2597_v34  ;;  %v883_v36 = vpack.c.bf16 %v2776_v27, %v2773_v29  ;;  %v575_v52 = vmax.f32 %v492_v39, 0.0 }
 0x1a7   : > { %v1942_v10 = vpop.eup %1941  ;;  %1951 = vrcp.f32 %v703_v57 }
 0x1a8   : > { %1953 = vpow2.f32 %v1693_v31  ;;  %v1694_v58 = vmul.f32 -1.442695, %v514_v35  ;;  %1105 = vmatmul.mubr.bf16.gmra.mrb[28].mxu1 %v883_v36  ;;  %v828_v54 = vmul.f32 %v1942_v10, %v796_v30  ;;  %v798_v36 = vsub.f32 %v574_v53, %v2528_v44 }
 0x1a9   : > { %v1944_v3 = vpop.eup %1943  ;;  %1114 = vmatprep.mubr.bf16.mxu1 %v2259_v0 }
 0x1aa   : > { %v1946_v2 = vpop.eup %1945  ;;  %1955 = vpow2.f32 %v1694_v58  ;;  %v2788_v49 = vpop.f32.mrb[48].mxu0  ;;  %v829_v59 = vmul.f32 %v1944_v3, %v797_v38  ;;  %v2794_v32 = vadd.f32 %v828_v54, %v2519_v41  ;;  %v502_v41 = vadd.f32 %v2749_v11, %v2606_v8 }
 0x1ab   : > { %v704_v61 = vadd.f32 1.0, %v1946_v2  ;;  %v519_v4 = vpop.f32.mrb[49].mxu0  ;;  %v576_v2 = vmax.f32 %v498_v33, 0.0 }
 0x1ac   : > { %v1948_v37 = vpop.eup %1947  ;;  %v520_v57 = vadd.f32 %v519_v4, %v2597_v34  ;;  %v2791_v43 = vpop.f32.mrb[50].mxu0  ;;  %v2797_v30 = vadd.f32 %v829_v59, %v2522_v42  ;;  %v799_v42 = vsub.f32 %v575_v52, %v2531_v45  ;;  %v577_v4 = vmax.f32 %v502_v41, 0.0 }
 0x1ad   : > { %1957 = vrcp.f32 %v704_v61  ;;  %v705_v31 = vadd.f32 1.0, %v1948_v37  ;;  %v523_v35 = vpop.f32.mrb[51].mxu0 }
 0x1ae   : > { %v1695_v10 = vmul.f32 -1.442695, %v520_v57  ;;  %v524_v38 = vadd.f32 %v523_v35, %v2597_v34  ;;  %v884_v39 = vpack.c.bf16 %v2797_v30, %v2794_v32 }
 0x1af   : > { %v1950_v58 = vpop.eup %1949  ;;  %1959 = vrcp.f32 %v705_v31 }
 0x1b0   : > { %1961 = vpow2.f32 %v1695_v10  ;;  %v1696_v19 = vmul.f32 -1.442695, %v524_v38  ;;  %1115 = vmatmul.mubr.bf16.gmra.mrb[32].mxu1 %v884_v39  ;;  %v830_v54 = vmul.f32 %v1950_v58, %v798_v36  ;;  %v800_v36 = vsub.f32 %v576_v2, %v2537_v47 }
 0x1b1   : > { %v1952_v3 = vpop.eup %1951  ;;  %1124 = vmatprep.mubr.bf16.mxu1 %v2259_v0  ;;  %v508_v39 = vadd.f32 %v2767_v16, %v2606_v8 }
 0x1b2   : > { %v1954_v53 = vpop.eup %1953  ;;  %1963 = vpow2.f32 %v1696_v19  ;;  %v2809_v59 = vpop.f32.mrb[52].mxu0  ;;  %v831_v61 = vmul.f32 %v1952_v3, %v799_v42  ;;  %v2815_v35 = vadd.f32 %v830_v54, %v2528_v44  ;;  %v801_v44 = vsub.f32 %v577_v4, %v2540_v48 }
 0x1b3   : > { %v706_v37 = vadd.f32 1.0, %v1954_v53  ;;  %v529_v57 = vpop.f32.mrb[53].mxu0  ;;  %v578_v53 = vmax.f32 %v508_v39, 0.0  ;;  %v518_v39 = vadd.f32 %v2788_v49, %v2606_v8 }
 0x1b4   : > { %v1956_v11 = vpop.eup %1955  ;;  %v530_v31 = vadd.f32 %v529_v57, %v2597_v34  ;;  %v2812_v52 = vpop.f32.mrb[54].mxu0  ;;  %v2818_v33 = vadd.f32 %v831_v61, %v2531_v45  ;;  %v512_v45 = vadd.f32 %v2770_v9, %v2606_v8 }
 0x1b5   : > { %1965 = vrcp.f32 %v706_v37  ;;  %v707_v10 = vadd.f32 1.0, %v1956_v11  ;;  %v533_v38 = vpop.f32.mrb[55].mxu0 }
 0x1b6   : > { %v1697_v58 = vmul.f32 -1.442695, %v530_v31  ;;  %v534_v41 = vadd.f32 %v533_v38, %v2597_v34  ;;  %v885_v42 = vpack.c.bf16 %v2818_v33, %v2815_v35  ;;  %v579_v31 = vmax.f32 %v512_v45, 0.0 }
 0x1b7   : > { %v1958_v19 = vpop.eup %1957  ;;  %1967 = vrcp.f32 %v707_v10 }
 0x1b8   : > { %1969 = vpow2.f32 %v1697_v58  ;;  %v1698_v54 = vmul.f32 -1.442695, %v534_v41  ;;  %1125 = vmatmul.mubr.bf16.gmra.mrb[36].mxu1 %v885_v42  ;;  %v832_v3 = vmul.f32 %v1958_v19, %v800_v36  ;;  %v802_v42 = vsub.f32 %v578_v53, %v2546_v50 }
 0x1b9   : > { %v1960_v2 = vpop.eup %1959  ;;  %1134 = vmatprep.mubr.bf16.mxu1 %v2259_v0 }
 0x1ba   : > { %v1962_v16 = vpop.eup %1961  ;;  %1971 = vpow2.f32 %v1698_v54  ;;  %v2830_v61 = vpop.f32.mrb[56].mxu0  ;;  %v833_v37 = vmul.f32 %v1960_v2, %v801_v44  ;;  %v2836_v38 = vadd.f32 %v832_v3, %v2537_v47  ;;  %v522_v47 = vadd.f32 %v2791_v43, %v2606_v8 }
 0x1bb   : > { %v708_v57 = vadd.f32 1.0, %v1962_v16  ;;  %v539_v11 = vpop.f32.mrb[57].mxu0  ;;  %v580_v16 = vmax.f32 %v518_v39, 0.0 }
 0x1bc   : > { %v1964_v4 = vpop.eup %1963  ;;  %v540_v10 = vadd.f32 %v539_v11, %v2597_v34  ;;  %v2833_v9 = vpop.f32.mrb[58].mxu0  ;;  %v2839_v36 = vadd.f32 %v833_v37, %v2540_v48  ;;  %v803_v48 = vsub.f32 %v579_v31, %v2549_v51  ;;  %v581_v11 = vmax.f32 %v522_v47, 0.0 }
 0x1bd   : > { %1973 = vrcp.f32 %v708_v57  ;;  %v709_v58 = vadd.f32 1.0, %v1964_v4  ;;  %v543_v41 = vpop.f32.mrb[59].mxu0  ;;  %v804_v39 = vsub.f32 %v580_v16, %v2555_v55 }
 0x1be   : > { %v1699_v19 = vmul.f32 -1.442695, %v540_v10  ;;  %v544_v44 = vadd.f32 %v543_v41, %v2597_v34  ;;  %v886_v45 = vpack.c.bf16 %v2839_v36, %v2836_v38 }
 0x1bf   : > { %v1966_v54 = vpop.eup %1965  ;;  %1975 = vrcp.f32 %v709_v58 }
 0x1c0   : > { %1977 = vpow2.f32 %v1699_v19  ;;  %v1700_v49 = vmul.f32 -1.442695, %v544_v44  ;;  %1135 = vmatmul.mubr.bf16.gmra.mrb[40].mxu1 %v886_v45  ;;  %v834_v3 = vmul.f32 %v1966_v54, %v802_v42  ;;  %v528_v45 = vadd.f32 %v2809_v59, %v2606_v8 }
 0x1c1   : > { %v1968_v2 = vpop.eup %1967  ;;  %1144 = vmatprep.mubr.bf16.mxu1 %v2259_v0 }
 0x1c2   : > { %v1970_v53 = vpop.eup %1969  ;;  %1979 = vpow2.f32 %v1700_v49  ;;  %v547_v37 = vpop.f32.mrb[60].mxu0  ;;  %v835_v57 = vmul.f32 %v1968_v2, %v803_v48  ;;  %v2853_v31 = vadd.f32 %v834_v3, %v2546_v50  ;;  %v805_v50 = vsub.f32 %v581_v11, %v2558_v56 }
 0x1c3   : > { %v710_v4 = vadd.f32 1.0, %v1970_v53  ;;  %v549_v10 = vpop.f32.mrb[61].mxu0  ;;  %v582_v53 = vmax.f32 %v528_v45, 0.0 }
 0x1c4   : > { %v1972_v41 = vpop.eup %1971  ;;  %v550_v43 = vadd.f32 %v549_v10, %v2597_v34  ;;  %v551_v58 = vpop.f32.mrb[62].mxu0  ;;  %v2856_v42 = vadd.f32 %v835_v57, %v2549_v51  ;;  %v532_v51 = vadd.f32 %v2812_v52, %v2606_v8 }
 0x1c5   : > { %1981 = vrcp.f32 %v710_v4  ;;  %v711_v19 = vadd.f32 1.0, %v1972_v41  ;;  %v553_v44 = vpop.f32.mrb[63].mxu0 }
 0x1c6   : > { %v1701_v54 = vmul.f32 -1.442695, %v550_v43  ;;  %v554_v47 = vadd.f32 %v553_v44, %v2597_v34  ;;  %v887_v48 = vpack.c.bf16 %v2856_v42, %v2853_v31  ;;  %v583_v10 = vmax.f32 %v532_v51, 0.0 }
 0x1c7   : > { %v1974_v49 = vpop.eup %1973  ;;  %1983 = vrcp.f32 %v711_v19  ;;  %v806_v43 = vsub.f32 %v582_v53, %v2564_v62 }
 0x1c8   : > { %1985 = vpow2.f32 %v1701_v54  ;;  %v1702_v3 = vmul.f32 -1.442695, %v554_v47  ;;  %1145 = vmatmul.mubr.bf16.gmra.mrb[44].mxu1 %v887_v48  ;;  %v836_v2 = vmul.f32 %v1974_v49, %v804_v39  ;;  %v538_v39 = vadd.f32 %v2830_v61, %v2606_v8 }
 0x1c9   : > { %v1976_v16 = vpop.eup %1975  ;;  %1154 = vmatprep.mubr.bf16.mxu1 %v2259_v0  ;;  %v807_v45 = vsub.f32 %v583_v10, %v2567_v63 }
 0x1ca   : > { %v1978_v59 = vpop.eup %1977  ;;  %1987 = vpow2.f32 %v1702_v3  ;;  %v837_v34 = vmul.f32 %v1976_v16, %v805_v50  ;;  %v2869_v11 = vadd.f32 %v836_v2, %v2555_v55  ;;  %v542_v55 = vadd.f32 %v2833_v9, %v2606_v8 }
 0x1cb   : > { %v712_v57 = vadd.f32 1.0, %v1978_v59  ;;  %v584_v48 = vmax.f32 %v538_v39, 0.0  ;;  %v548_v59 = vadd.f32 %v547_v37, %v2606_v8 }
 0x1cc   : > { %v1980_v4 = vpop.eup %1979  ;;  %v2872_v41 = vadd.f32 %v837_v34, %v2558_v56  ;;  %v585_v51 = vmax.f32 %v542_v55, 0.0 }
 0x1cd   : > { %1989 = vrcp.f32 %v712_v57  ;;  %v713_v52 = vadd.f32 1.0, %v1980_v4  ;;  %v808_v9 = vsub.f32 %v584_v48, %v2573_v6  ;;  %v552_v4 = vadd.f32 %v551_v58, %v2606_v8 }
 0x1ce   : > { %v888_v19 = vpack.c.bf16 %v2872_v41, %v2869_v11  ;;  %v809_v57 = vsub.f32 %v585_v51, %v2576_v7 }
 0x1cf   : > { %v1982_v44 = vpop.eup %1981  ;;  %1991 = vrcp.f32 %v713_v52 }
 0x1d0   : > { %1155 = vmatmul.mubr.bf16.gmra.mrb[48].mxu1 %v888_v19  ;;  %v838_v56 = vmul.f32 %v1982_v44, %v806_v43  ;;  %v587_v43 = vmax.f32 %v552_v4, 0.0 }
 0x1d1   : > { %v1984_v54 = vpop.eup %1983  ;;  %1164 = vmatprep.mubr.bf16.mxu1 %v2259_v0 }
 0x1d2   : > { %v1986_v47 = vpop.eup %1985  ;;  %v839_v49 = vmul.f32 %v1984_v54, %v807_v45  ;;  %v2884_v3 = vadd.f32 %v838_v56, %v2564_v62  ;;  %v811_v58 = vsub.f32 %v587_v43, %v2585_v14 }
 0x1d3   : > { %v714_v50 = vadd.f32 1.0, %v1986_v47  ;;  %v1703_v47 = vld [vmem:[%s3215_s2 + $0x1] ss:$2 sm:$0x3] }
 0x1d4   : > { %v1988_v61 = vpop.eup %1987  ;;  %v2887_v2 = vadd.f32 %v839_v49, %v2567_v63  ;;  %v586_v63 = vmax.f32 %v548_v59, 0.0  ;;  %v2920_v48 = vrot.slane %v1703_v47, %v279_v28 }
 0x1d5   : > { %1993 = vrcp.f32 %v714_v50  ;;  %v715_v16 = vadd.f32 1.0, %v1988_v61 }
 0x1d6   : > { %v889_v53 = vpack.c.bf16 %v2887_v2, %v2884_v3  ;;  %v810_v19 = vsub.f32 %v586_v63, %v2582_v13  ;;  %v2928_v63 = vrot.slane %v1703_v47, %v275_v1 }
 0x1d7   : > { %v1990_v34 = vpop.eup %1989  ;;  %1995 = vrcp.f32 %v715_v16 }
 0x1d8   : > { %1165 = vmatmul.mubr.bf16.gmra.mrb[52].mxu1 %v889_v53  ;;  %v840_v62 = vmul.f32 %v1990_v34, %v808_v9 }
 0x1d9   : > { %v1992_v10 = vpop.eup %1991  ;;  %1174 = vmatprep.mubr.bf16.mxu1 %v2259_v0 }
 0x1da   : > { %v841_v52 = vmul.f32 %v1992_v10, %v809_v57  ;;  %v2897_v39 = vadd.f32 %v840_v62, %v2573_v6 }
 0x1dc   : > { %v2900_v37 = vadd.f32 %v841_v52, %v2576_v7 }
 0x1de   : > { %v890_v44 = vpack.c.bf16 %v2900_v37, %v2897_v39 }
 0x1df   : > { %v1994_v8 = vpop.eup %1993 }
 0x1e0   : > { %1175 = vmatmul.mubr.bf16.gmra.mrb[56].mxu1 %v890_v44  ;;  %v842_v45 = vmul.f32 %v1994_v8, %v810_v19 }
 0x1e1   : > { %v1996_v55 = vpop.eup %1995  ;;  %1184 = vmatprep.mubr.bf16.mxu1 %v2259_v0 }
 0x1e2   : > { %v843_v56 = vmul.f32 %v1996_v55, %v811_v58  ;;  %v2908_v6 = vadd.f32 %v842_v45, %v2582_v13 }
 0x1e4   : > { %v2911_v7 = vadd.f32 %v843_v56, %v2585_v14 }
 0x1e6   : > { %v891_v54 = vpack.c.bf16 %v2911_v7, %v2908_v6 }
 0x1e8   : > { %1185 = vmatmul.mubr.bf16.gmra.mrb[60].mxu1 %v891_v54 }
 0x243   : > { %v1036_v0 = vpop.f32.mrb[0].mxu1 }
 0x244   : > { %v1038_v49 = vpop.f32.mrb[1].mxu1  ;;  %v1037_v56 = vadd.f32 %v1036_v0, %v2928_v63 }
 0x245   : > { %v1039_v13 = vadd.f32 %v1038_v49, %v2920_v48  ;;  %v1040_v50 = vpop.f32.mrb[2].mxu1 }
 0x246   : > { %v1042_v61 = vpop.f32.mrb[3].mxu1  ;;  %v1041_v25 = vadd.f32 %v1040_v50, %v2928_v63 }
 0x247   : > { %v1720_v14 = vmul.f32 -1.442695, %v1039_v13  ;;  %v1043_v51 = vadd.f32 %v1042_v61, %v2920_v48  ;;  %v1195_v13 = vmax.f32 %v1037_v56, 0.0 }
 0x249   : > { %1997 = vpow2.f32 %v1720_v14  ;;  %v1721_v16 = vmul.f32 -1.442695, %v1043_v51  ;;  %v1196_v14 = vmax.f32 %v1041_v25, 0.0  ;;  %v1419_v50 = vsub.f32 %v1195_v13, %v2628_v60 }
 0x24b   : > { %1999 = vpow2.f32 %v1721_v16  ;;  %v1046_v9 = vpop.f32.mrb[4].mxu1 }
 0x24c   : > { %v1048_v59 = vpop.f32.mrb[5].mxu1 }
 0x24d   : > { %v1049_v53 = vadd.f32 %v1048_v59, %v2920_v48  ;;  %v1050_v34 = vpop.f32.mrb[6].mxu1 }
 0x24e   : > { %v1052_v57 = vpop.f32.mrb[7].mxu1 }
 0x24f   : > { %v1722_v28 = vmul.f32 -1.442695, %v1049_v53  ;;  %v1053_v4 = vadd.f32 %v1052_v57, %v2920_v48 }
 0x251   : > { %2001 = vpow2.f32 %v1722_v28  ;;  %v1723_v62 = vmul.f32 -1.442695, %v1053_v4  ;;  %v1047_v4 = vadd.f32 %v1046_v9, %v2928_v63 }
 0x253   : > { %v1998_v10 = vpop.eup %1997  ;;  %2003 = vpow2.f32 %v1723_v62  ;;  %v1056_v52 = vpop.f32.mrb[8].mxu1  ;;  %v1197_v25 = vmax.f32 %v1047_v4, 0.0 }
 0x254   : > { %v1323_v43 = vadd.f32 1.0, %v1998_v10  ;;  %v1058_v19 = vpop.f32.mrb[9].mxu1 }
 0x255   : > { %v2000_v44 = vpop.eup %1999  ;;  %v1059_v8 = vadd.f32 %v1058_v19, %v2920_v48  ;;  %v1060_v58 = vpop.f32.mrb[10].mxu1  ;;  %v1420_v19 = vsub.f32 %v1196_v14, %v2631_v5 }
 0x256   : > { %2005 = vrcp.f32 %v1323_v43  ;;  %v1324_v45 = vadd.f32 1.0, %v2000_v44  ;;  %v1062_v55 = vpop.f32.mrb[11].mxu1 }
 0x257   : > { %v1724_v54 = vmul.f32 -1.442695, %v1059_v8  ;;  %v1063_v49 = vadd.f32 %v1062_v55, %v2920_v48  ;;  %v1051_v8 = vadd.f32 %v1050_v34, %v2928_v63 }
 0x258   : > { %2007 = vrcp.f32 %v1324_v45 }
 0x259   : > { %2009 = vpow2.f32 %v1724_v54  ;;  %v1725_v1 = vmul.f32 -1.442695, %v1063_v49  ;;  %v1198_v14 = vmax.f32 %v1051_v8, 0.0 }
 0x25b   : > { %v2002_v47 = vpop.eup %2001  ;;  %2011 = vpow2.f32 %v1725_v1  ;;  %v2934_v61 = vpop.f32.mrb[12].mxu1 }
 0x25c   : > { %v1325_v51 = vadd.f32 1.0, %v2002_v47  ;;  %v1068_v16 = vpop.f32.mrb[13].mxu1 }
 0x25d   : > { %v2004_v59 = vpop.eup %2003  ;;  %v1069_v53 = vadd.f32 %v1068_v16, %v2920_v48  ;;  %v2937_v0 = vpop.f32.mrb[14].mxu1 }
 0x25e   : > { %2013 = vrcp.f32 %v1325_v51  ;;  %v1326_v57 = vadd.f32 1.0, %v2004_v59  ;;  %v1072_v28 = vpop.f32.mrb[15].mxu1 }
 0x25f   : > { %v1726_v62 = vmul.f32 -1.442695, %v1069_v53  ;;  %v1073_v10 = vadd.f32 %v1072_v28, %v2920_v48  ;;  %v1421_v53 = vsub.f32 %v1197_v25, %v2647_v12 }
 0x260   : > { %v2006_v43 = vpop.eup %2005  ;;  %2015 = vrcp.f32 %v1326_v57  ;;  %v1057_v57 = vadd.f32 %v1056_v52, %v2928_v63 }
 0x261   : > { %v1451_v44 = vmul.f32 %v2006_v43, %v1419_v50  ;;  %2017 = vpow2.f32 %v1726_v62  ;;  %v1727_v45 = vmul.f32 -1.442695, %v1073_v10  ;;  %v1061_v62 = vadd.f32 %v1060_v58, %v2928_v63 }
 0x262   : > { %v2008_v55 = vpop.eup %2007  ;;  %v1422_v10 = vsub.f32 %v1198_v14, %v2650_v46  ;;  %v1199_v52 = vmax.f32 %v1057_v57, 0.0  ;;  %v1067_v14 = vadd.f32 %v2934_v61, %v2928_v63  ;;  %v1071_v57 = vadd.f32 %v2937_v0, %v2928_v63 }
 0x263   : > { %v2010_v56 = vpop.eup %2009  ;;  %v1483_v54 = vadd.f32 %v1451_v44, %v2628_v60  ;;  %v1452_v49 = vmul.f32 %v2008_v55, %v1420_v19  ;;  %2019 = vpow2.f32 %v1727_v45  ;;  %v2945_v9 = vpop.f32.mrb[16].mxu1 }
 0x264   : > { %v1327_v1 = vadd.f32 1.0, %v2010_v56  ;;  %v1078_v47 = vpop.f32.mrb[17].mxu1  ;;  %v1200_v56 = vmax.f32 %v1061_v62, 0.0 }
 0x265   : > { %v2012_v13 = vpop.eup %2011  ;;  %1515 = vst [vmem:[%s2949_s4] sm:$0xff] %v1483_v54  ;;  %v1484_v34 = vadd.f32 %v1452_v49, %v2631_v5  ;;  %v1079_v51 = vadd.f32 %v1078_v47, %v2920_v48  ;;  %v2954_v60 = vpop.f32.mrb[18].mxu1 }
 0x266   : > { %2021 = vrcp.f32 %v1327_v1  ;;  %v1328_v16 = vadd.f32 1.0, %v2012_v13  ;;  %v1082_v59 = vpop.f32.mrb[19].mxu1 }
 0x267   : > { %1516 = vst [vmem:[%s2949_s4 + $0x8] sm:$0xff] %v1484_v34  ;;  %v1728_v28 = vmul.f32 -1.442695, %v1079_v51  ;;  %v1083_v50 = vadd.f32 %v1082_v59, %v2920_v48  ;;  %v1423_v34 = vsub.f32 %v1199_v52, %v2668_v22 }
 0x268   : > { %v2014_v4 = vpop.eup %2013  ;;  %2023 = vrcp.f32 %v1328_v16 }
 0x269   : > { %v1453_v5 = vmul.f32 %v2014_v4, %v1421_v53  ;;  %2025 = vpow2.f32 %v1728_v28  ;;  %v1729_v43 = vmul.f32 -1.442695, %v1083_v50  ;;  %v1424_v53 = vsub.f32 %v1200_v56, %v2671_v15 }
 0x26a   : > { %v2016_v19 = vpop.eup %2015 }
 0x26b   : > { %v2018_v44 = vpop.eup %2017  ;;  %v1485_v8 = vadd.f32 %v1453_v5, %v2647_v12  ;;  %v1454_v45 = vmul.f32 %v2016_v19, %v1422_v10  ;;  %2027 = vpow2.f32 %v1729_v43  ;;  %v2963_v55 = vpop.f32.mrb[20].mxu1  ;;  %v1201_v5 = vmax.f32 %v1067_v14, 0.0 }
 0x26c   : > { %v1329_v54 = vadd.f32 1.0, %v2018_v44  ;;  %v1088_v58 = vpop.f32.mrb[21].mxu1 }
 0x26d   : > { %v2020_v49 = vpop.eup %2019  ;;  %1517 = vst [vmem:[%s2949_s4 + $0x10] sm:$0xff] %v1485_v8  ;;  %v1486_v25 = vadd.f32 %v1454_v45, %v2650_v46  ;;  %v1089_v1 = vadd.f32 %v1088_v58, %v2920_v48  ;;  %v2968_v47 = vpop.f32.mrb[22].mxu1  ;;  %v1202_v45 = vmax.f32 %v1071_v57, 0.0  ;;  %v1077_v58 = vadd.f32 %v2945_v9, %v2928_v63 }
 0x26e   : > { %2029 = vrcp.f32 %v1329_v54  ;;  %v1330_v13 = vadd.f32 1.0, %v2020_v49  ;;  %v1092_v12 = vpop.f32.mrb[23].mxu1  ;;  %v1425_v54 = vsub.f32 %v1201_v5, %v2689_v17 }
 0x26f   : > { %1518 = vst [vmem:[%s2949_s4 + $0x18] sm:$0xff] %v1486_v25  ;;  %v1730_v51 = vmul.f32 -1.442695, %v1089_v1  ;;  %v1093_v16 = vadd.f32 %v1092_v12, %v2920_v48  ;;  %v1426_v12 = vsub.f32 %v1202_v45, %v2692_v40 }
 0x270   : > { %v2022_v59 = vpop.eup %2021  ;;  %2031 = vrcp.f32 %v1330_v13 }
 0x271   : > { %v1455_v46 = vmul.f32 %v2022_v59, %v1423_v34  ;;  %2033 = vpow2.f32 %v1730_v51  ;;  %v1731_v28 = vmul.f32 -1.442695, %v1093_v16  ;;  %v1203_v59 = vmax.f32 %v1077_v58, 0.0 }
 0x272   : > { %v2024_v50 = vpop.eup %2023 }
 0x273   : > { %v2026_v4 = vpop.eup %2025  ;;  %v1487_v62 = vadd.f32 %v1455_v46, %v2668_v22  ;;  %v1456_v61 = vmul.f32 %v2024_v50, %v1424_v53  ;;  %2035 = vpow2.f32 %v1731_v28  ;;  %v2979_v10 = vpop.f32.mrb[24].mxu1  ;;  %v1427_v5 = vsub.f32 %v1203_v59, %v2710_v20 }
 0x274   : > { %v1331_v43 = vadd.f32 1.0, %v2026_v4  ;;  %v1098_v19 = vpop.f32.mrb[25].mxu1 }
 0x275   : > { %v2028_v44 = vpop.eup %2027  ;;  %1519 = vst [vmem:[%s2949_s4 + $0x20] sm:$0xff] %v1487_v62  ;;  %v1488_v8 = vadd.f32 %v1456_v61, %v2671_v15  ;;  %v1099_v0 = vadd.f32 %v1098_v19, %v2920_v48  ;;  %v2984_v52 = vpop.f32.mrb[26].mxu1  ;;  %v1081_v15 = vadd.f32 %v2954_v60, %v2928_v63 }
 0x276   : > { %2037 = vrcp.f32 %v1331_v43  ;;  %v1332_v56 = vadd.f32 1.0, %v2028_v44  ;;  %v1102_v22 = vpop.f32.mrb[27].mxu1  ;;  %v1087_v43 = vadd.f32 %v2963_v55, %v2928_v63 }
 0x277   : > { %1520 = vst [vmem:[%s2949_s4 + $0x28] sm:$0xff] %v1488_v8  ;;  %v1732_v49 = vmul.f32 -1.442695, %v1099_v0  ;;  %v1103_v25 = vadd.f32 %v1102_v22, %v2920_v48  ;;  %v1204_v46 = vmax.f32 %v1081_v15, 0.0  ;;  %v1091_v0 = vadd.f32 %v2968_v47, %v2928_v63 }
 0x278   : > { %v2030_v1 = vpop.eup %2029  ;;  %2039 = vrcp.f32 %v1332_v56 }
 0x279   : > { %v1457_v13 = vmul.f32 %v2030_v1, %v1425_v54  ;;  %2041 = vpow2.f32 %v1732_v49  ;;  %v1733_v34 = vmul.f32 -1.442695, %v1103_v25  ;;  %v1428_v45 = vsub.f32 %v1204_v46, %v2713_v18 }
 0x27a   : > { %v2032_v14 = vpop.eup %2031  ;;  %v1205_v49 = vmax.f32 %v1087_v43, 0.0 }
 0x27b   : > { %v2034_v51 = vpop.eup %2033  ;;  %v1489_v16 = vadd.f32 %v1457_v13, %v2689_v17  ;;  %v1458_v9 = vmul.f32 %v2032_v14, %v1426_v12  ;;  %2043 = vpow2.f32 %v1733_v34  ;;  %v2995_v53 = vpop.f32.mrb[28].mxu1  ;;  %v1206_v34 = vmax.f32 %v1091_v0, 0.0 }
 0x27c   : > { %v1333_v57 = vadd.f32 1.0, %v2034_v51  ;;  %v1108_v60 = vpop.f32.mrb[29].mxu1 }
 0x27d   : > { %v2036_v28 = vpop.eup %2035  ;;  %1521 = vst [vmem:[%s2949_s4 + $0x30] sm:$0xff] %v1489_v16  ;;  %v1490_v50 = vadd.f32 %v1458_v9, %v2692_v40  ;;  %v1109_v4 = vadd.f32 %v1108_v60, %v2920_v48  ;;  %v3000_v62 = vpop.f32.mrb[30].mxu1  ;;  %v1429_v16 = vsub.f32 %v1205_v49, %v2731_v23  ;;  %v1097_v9 = vadd.f32 %v2979_v10, %v2928_v63 }
 0x27e   : > { %2045 = vrcp.f32 %v1333_v57  ;;  %v1334_v61 = vadd.f32 1.0, %v2036_v28  ;;  %v1112_v17 = vpop.f32.mrb[31].mxu1  ;;  %v1430_v28 = vsub.f32 %v1206_v34, %v2734_v21 }
 0x27f   : > { %1522 = vst [vmem:[%s2949_s4 + $0x38] sm:$0xff] %v1490_v50  ;;  %v1734_v19 = vmul.f32 -1.442695, %v1109_v4  ;;  %v1113_v44 = vadd.f32 %v1112_v17, %v2920_v48 }
 0x280   : > { %v2038_v8 = vpop.eup %2037  ;;  %2047 = vrcp.f32 %v1334_v61 }
 0x281   : > { %v1459_v40 = vmul.f32 %v2038_v8, %v1427_v5  ;;  %2049 = vpow2.f32 %v1734_v19  ;;  %v1735_v56 = vmul.f32 -1.442695, %v1113_v44  ;;  %v1207_v5 = vmax.f32 %v1097_v9, 0.0 }
 0x282   : > { %v2040_v22 = vpop.eup %2039 }
 0x283   : > { %v2042_v54 = vpop.eup %2041  ;;  %v1491_v58 = vadd.f32 %v1459_v40, %v2710_v20  ;;  %v1460_v55 = vmul.f32 %v2040_v22, %v1428_v45  ;;  %2051 = vpow2.f32 %v1735_v56  ;;  %v3011_v25 = vpop.f32.mrb[32].mxu1  ;;  %v1431_v22 = vsub.f32 %v1207_v5, %v2752_v26 }
 0x284   : > { %v1335_v1 = vadd.f32 1.0, %v2042_v54  ;;  %v1118_v15 = vpop.f32.mrb[33].mxu1  ;;  %v1107_v54 = vadd.f32 %v2995_v53, %v2928_v63 }
 0x285   : > { %v2044_v13 = vpop.eup %2043  ;;  %1523 = vst [vmem:[%s2949_s4 + $0x40] sm:$0xff] %v1491_v58  ;;  %v1492_v12 = vadd.f32 %v1460_v55, %v2713_v18  ;;  %v1119_v47 = vadd.f32 %v1118_v15, %v2920_v48  ;;  %v3016_v14 = vpop.f32.mrb[34].mxu1  ;;  %v1101_v18 = vadd.f32 %v2984_v52, %v2928_v63  ;;  %v1111_v15 = vadd.f32 %v3000_v62, %v2928_v63 }
 0x286   : > { %2053 = vrcp.f32 %v1335_v1  ;;  %v1336_v51 = vadd.f32 1.0, %v2044_v13  ;;  %v1122_v20 = vpop.f32.mrb[35].mxu1 }
 0x287   : > { %1524 = vst [vmem:[%s2949_s4 + $0x48] sm:$0xff] %v1492_v12  ;;  %v1736_v59 = vmul.f32 -1.442695, %v1119_v47  ;;  %v1123_v46 = vadd.f32 %v1122_v20, %v2920_v48  ;;  %v1208_v19 = vmax.f32 %v1101_v18, 0.0 }
 0x288   : > { %v2046_v57 = vpop.eup %2045  ;;  %2055 = vrcp.f32 %v1336_v51  ;;  %v1209_v51 = vmax.f32 %v1107_v54, 0.0 }
 0x289   : > { %v1461_v60 = vmul.f32 %v2046_v57, %v1429_v16  ;;  %2057 = vpow2.f32 %v1736_v59  ;;  %v1737_v50 = vmul.f32 -1.442695, %v1123_v46  ;;  %v1432_v1 = vsub.f32 %v1208_v19, %v2755_v24 }
 0x28a   : > { %v2048_v4 = vpop.eup %2047  ;;  %v1210_v57 = vmax.f32 %v1111_v15, 0.0 }
 0x28b   : > { %v2050_v61 = vpop.eup %2049  ;;  %v1493_v17 = vadd.f32 %v1461_v60, %v2731_v23  ;;  %v1462_v10 = vmul.f32 %v2048_v4, %v1430_v28  ;;  %2059 = vpow2.f32 %v1737_v50  ;;  %v3027_v43 = vpop.f32.mrb[36].mxu1  ;;  %v1433_v28 = vsub.f32 %v1209_v51, %v2773_v29 }
 0x28c   : > { %v1337_v44 = vadd.f32 1.0, %v2050_v61  ;;  %v1128_v52 = vpop.f32.mrb[37].mxu1  ;;  %v1117_v50 = vadd.f32 %v3011_v25, %v2928_v63  ;;  %v1434_v5 = vsub.f32 %v1210_v57, %v2776_v27 }
 0x28d   : > { %v2052_v8 = vpop.eup %2051  ;;  %1525 = vst [vmem:[%s2949_s4 + $0x50] sm:$0xff] %v1493_v17  ;;  %v1494_v45 = vadd.f32 %v1462_v10, %v2734_v21  ;;  %v1129_v40 = vadd.f32 %v1128_v52, %v2920_v48  ;;  %v3032_v0 = vpop.f32.mrb[38].mxu1 }
 0x28e   : > { %2061 = vrcp.f32 %v1337_v44  ;;  %v1338_v56 = vadd.f32 1.0, %v2052_v8  ;;  %v1132_v23 = vpop.f32.mrb[39].mxu1 }
 0x28f   : > { %1526 = vst [vmem:[%s2949_s4 + $0x58] sm:$0xff] %v1494_v45  ;;  %v1738_v58 = vmul.f32 -1.442695, %v1129_v40  ;;  %v1133_v55 = vadd.f32 %v1132_v23, %v2920_v48  ;;  %v1211_v45 = vmax.f32 %v1117_v50, 0.0 }
 0x290   : > { %v2054_v49 = vpop.eup %2053  ;;  %2063 = vrcp.f32 %v1338_v56 }
 0x291   : > { %v1463_v21 = vmul.f32 %v2054_v49, %v1431_v22  ;;  %2065 = vpow2.f32 %v1738_v58  ;;  %v1739_v13 = vmul.f32 -1.442695, %v1133_v55 }
 0x292   : > { %v2056_v12 = vpop.eup %2055 }
 0x293   : > { %v2058_v34 = vpop.eup %2057  ;;  %v1495_v47 = vadd.f32 %v1463_v21, %v2752_v26  ;;  %v1464_v53 = vmul.f32 %v2056_v12, %v1432_v1  ;;  %2067 = vpow2.f32 %v1739_v13  ;;  %v3043_v20 = vpop.f32.mrb[40].mxu1  ;;  %v1435_v1 = vsub.f32 %v1211_v45, %v2794_v32 }
 0x294   : > { %v1339_v16 = vadd.f32 1.0, %v2058_v34  ;;  %v1138_v9 = vpop.f32.mrb[41].mxu1  ;;  %v1127_v21 = vadd.f32 %v3027_v43, %v2928_v63 }
 0x295   : > { %v2060_v59 = vpop.eup %2059  ;;  %1527 = vst [vmem:[%s2949_s4 + $0x60] sm:$0xff] %v1495_v47  ;;  %v1496_v46 = vadd.f32 %v1464_v53, %v2755_v24  ;;  %v1139_v62 = vadd.f32 %v1138_v9, %v2920_v48  ;;  %v3048_v18 = vpop.f32.mrb[42].mxu1  ;;  %v1121_v24 = vadd.f32 %v3016_v14, %v2928_v63  ;;  %v1131_v47 = vadd.f32 %v3032_v0, %v2928_v63 }
 0x296   : > { %2069 = vrcp.f32 %v1339_v16  ;;  %v1340_v60 = vadd.f32 1.0, %v2060_v59  ;;  %v1142_v26 = vpop.f32.mrb[43].mxu1  ;;  %v1213_v59 = vmax.f32 %v1127_v21, 0.0 }
 0x297   : > { %1528 = vst [vmem:[%s2949_s4 + $0x68] sm:$0xff] %v1496_v46  ;;  %v1740_v4 = vmul.f32 -1.442695, %v1139_v62  ;;  %v1143_v61 = vadd.f32 %v1142_v26, %v2920_v48  ;;  %v1212_v56 = vmax.f32 %v1121_v24, 0.0 }
 0x298   : > { %v2062_v17 = vpop.eup %2061  ;;  %2071 = vrcp.f32 %v1340_v60 }
 0x299   : > { %v1465_v10 = vmul.f32 %v2062_v17, %v1433_v28  ;;  %2073 = vpow2.f32 %v1740_v4  ;;  %v1741_v19 = vmul.f32 -1.442695, %v1143_v61  ;;  %v1436_v34 = vsub.f32 %v1212_v56, %v2797_v30 }
 0x29a   : > { %v2064_v44 = vpop.eup %2063  ;;  %v1214_v28 = vmax.f32 %v1131_v47, 0.0  ;;  %v1437_v61 = vsub.f32 %v1213_v59, %v2815_v35  ;;  %v1137_v17 = vadd.f32 %v3043_v20, %v2928_v63 }
 0x29b   : > { %v2066_v52 = vpop.eup %2065  ;;  %v1497_v8 = vadd.f32 %v1465_v10, %v2773_v29  ;;  %v1466_v25 = vmul.f32 %v2064_v44, %v1434_v5  ;;  %2075 = vpow2.f32 %v1741_v19  ;;  %v3059_v40 = vpop.f32.mrb[44].mxu1 }
 0x29c   : > { %v1341_v23 = vadd.f32 1.0, %v2066_v52  ;;  %v1148_v14 = vpop.f32.mrb[45].mxu1  ;;  %v1438_v44 = vsub.f32 %v1214_v28, %v2818_v33  ;;  %v1215_v56 = vmax.f32 %v1137_v17, 0.0 }
 0x29d   : > { %v2068_v22 = vpop.eup %2067  ;;  %1529 = vst [vmem:[%s2949_s4 + $0x70] sm:$0xff] %v1497_v8  ;;  %v1498_v54 = vadd.f32 %v1466_v25, %v2776_v27  ;;  %v1149_v58 = vadd.f32 %v1148_v14, %v2920_v48  ;;  %v3064_v55 = vpop.f32.mrb[46].mxu1 }
 0x29e   : > { %2077 = vrcp.f32 %v1341_v23  ;;  %v1342_v49 = vadd.f32 1.0, %v2068_v22  ;;  %v1152_v29 = vpop.f32.mrb[47].mxu1  ;;  %v1439_v21 = vsub.f32 %v1215_v56, %v2836_v38  ;;  %v1151_v47 = vadd.f32 %v3064_v55, %v2928_v63 }
 0x29f   : > { %1530 = vst [vmem:[%s2949_s4 + $0x78] sm:$0xff] %v1498_v54  ;;  %v1742_v15 = vmul.f32 -1.442695, %v1149_v58  ;;  %v1153_v13 = vadd.f32 %v1152_v29, %v2920_v48 }
 0x2a0   : > { %v2070_v12 = vpop.eup %2069  ;;  %2079 = vrcp.f32 %v1342_v49  ;;  %v1218_v28 = vmax.f32 %v1151_v47, 0.0 }
 0x2a1   : > { %v1467_v27 = vmul.f32 %v2070_v12, %v1435_v1  ;;  %2081 = vpow2.f32 %v1742_v15  ;;  %v1743_v53 = vmul.f32 -1.442695, %v1153_v13  ;;  %v1147_v15 = vadd.f32 %v3059_v40, %v2928_v63 }
 0x2a2   : > { %v2072_v51 = vpop.eup %2071 }
 0x2a3   : > { %v2074_v16 = vpop.eup %2073  ;;  %v1499_v9 = vadd.f32 %v1467_v27, %v2794_v32  ;;  %v1468_v43 = vmul.f32 %v2072_v51, %v1436_v34  ;;  %2083 = vpow2.f32 %v1743_v53  ;;  %v3075_v46 = vpop.f32.mrb[48].mxu1 }
 0x2a4   : > { %v1343_v57 = vadd.f32 1.0, %v2074_v16  ;;  %v1158_v62 = vpop.f32.mrb[49].mxu1 }
 0x2a5   : > { %v2076_v60 = vpop.eup %2075  ;;  %1531 = vst [vmem:[%s2949_s4 + $0x80] sm:$0xff] %v1499_v9  ;;  %v1500_v26 = vadd.f32 %v1468_v43, %v2797_v30  ;;  %v1159_v0 = vadd.f32 %v1158_v62, %v2920_v48  ;;  %v3080_v50 = vpop.f32.mrb[50].mxu1  ;;  %v1141_v30 = vadd.f32 %v3048_v18, %v2928_v63  ;;  %v1217_v43 = vmax.f32 %v1147_v15, 0.0 }
 0x2a6   : > { %2085 = vrcp.f32 %v1343_v57  ;;  %v1344_v4 = vadd.f32 1.0, %v2076_v60  ;;  %v1162_v32 = vpop.f32.mrb[51].mxu1 }
 0x2a7   : > { %1532 = vst [vmem:[%s2949_s4 + $0x88] sm:$0xff] %v1500_v26  ;;  %v1744_v24 = vmul.f32 -1.442695, %v1159_v0  ;;  %v1163_v10 = vadd.f32 %v1162_v32, %v2920_v48  ;;  %v1216_v14 = vmax.f32 %v1141_v30, 0.0  ;;  %v1441_v32 = vsub.f32 %v1217_v43, %v2853_v31 }
 0x2a8   : > { %v2078_v5 = vpop.eup %2077  ;;  %2087 = vrcp.f32 %v1344_v4  ;;  %v1442_v30 = vsub.f32 %v1218_v28, %v2856_v42 }
 0x2a9   : > { %v1469_v19 = vmul.f32 %v2078_v5, %v1437_v61  ;;  %2089 = vpow2.f32 %v1744_v24  ;;  %v1745_v52 = vmul.f32 -1.442695, %v1163_v10  ;;  %v1440_v27 = vsub.f32 %v1216_v14, %v2839_v36 }
 0x2aa   : > { %v2080_v8 = vpop.eup %2079  ;;  %v1157_v61 = vadd.f32 %v3075_v46, %v2928_v63 }
 0x2ab   : > { %v2082_v25 = vpop.eup %2081  ;;  %v1501_v45 = vadd.f32 %v1469_v19, %v2815_v35  ;;  %v1470_v20 = vmul.f32 %v2080_v8, %v1438_v44  ;;  %2091 = vpow2.f32 %v1745_v52  ;;  %v3091_v23 = vpop.f32.mrb[52].mxu1 }
 0x2ac   : > { %v1345_v22 = vadd.f32 1.0, %v2082_v25  ;;  %v1168_v18 = vpop.f32.mrb[53].mxu1  ;;  %v1219_v25 = vmax.f32 %v1157_v61, 0.0 }
 0x2ad   : > { %v2084_v54 = vpop.eup %2083  ;;  %1533 = vst [vmem:[%s2949_s4 + $0x90] sm:$0xff] %v1501_v45  ;;  %v1502_v58 = vadd.f32 %v1470_v20, %v2818_v33  ;;  %v1169_v49 = vadd.f32 %v1168_v18, %v2920_v48  ;;  %v3096_v29 = vpop.f32.mrb[54].mxu1 }
 0x2ae   : > { %2093 = vrcp.f32 %v1345_v22  ;;  %v1346_v1 = vadd.f32 1.0, %v2084_v54  ;;  %v1172_v35 = vpop.f32.mrb[55].mxu1 }
 0x2af   : > { %1534 = vst [vmem:[%s2949_s4 + $0x98] sm:$0xff] %v1502_v58  ;;  %v1746_v13 = vmul.f32 -1.442695, %v1169_v49  ;;  %v1173_v12 = vadd.f32 %v1172_v35, %v2920_v48 }
 0x2b0   : > { %v2086_v34 = vpop.eup %2085  ;;  %2095 = vrcp.f32 %v1346_v1  ;;  %v1167_v1 = vadd.f32 %v3091_v23, %v2928_v63 }
 0x2b1   : > { %v1471_v33 = vmul.f32 %v2086_v34, %v1439_v21  ;;  %2097 = vpow2.f32 %v1746_v13  ;;  %v1747_v53 = vmul.f32 -1.442695, %v1173_v12  ;;  %v1171_v12 = vadd.f32 %v3096_v29, %v2928_v63 }
 0x2b2   : > { %v2088_v51 = vpop.eup %2087 }
 0x2b3   : > { %v2090_v16 = vpop.eup %2089  ;;  %v1503_v9 = vadd.f32 %v1471_v33, %v2836_v38  ;;  %v1472_v40 = vmul.f32 %v2088_v51, %v1440_v27  ;;  %2099 = vpow2.f32 %v1747_v53  ;;  %v3107_v59 = vpop.f32.mrb[56].mxu1  ;;  %v1221_v53 = vmax.f32 %v1167_v1, 0.0 }
 0x2b4   : > { %v1347_v57 = vadd.f32 1.0, %v2090_v16  ;;  %v1178_v62 = vpop.f32.mrb[57].mxu1  ;;  %v1177_v43 = vadd.f32 %v3107_v59, %v2928_v63 }
 0x2b5   : > { %v2092_v60 = vpop.eup %2091  ;;  %1535 = vst [vmem:[%s2949_s4 + $0xa0] sm:$0xff] %v1503_v9  ;;  %v1504_v26 = vadd.f32 %v1472_v40, %v2839_v36  ;;  %v1179_v55 = vadd.f32 %v1178_v62, %v2920_v48  ;;  %v3112_v0 = vpop.f32.mrb[58].mxu1  ;;  %v1161_v36 = vadd.f32 %v3080_v50, %v2928_v63  ;;  %v1222_v9 = vmax.f32 %v1171_v12, 0.0 }
 0x2b6   : > { %2101 = vrcp.f32 %v1347_v57  ;;  %v1348_v4 = vadd.f32 1.0, %v2092_v60  ;;  %v1182_v38 = vpop.f32.mrb[59].mxu1  ;;  %v1445_v29 = vsub.f32 %v1221_v53, %v2884_v3  ;;  %v1181_v60 = vadd.f32 %v3112_v0, %v2928_v63 }
 0x2b7   : > { %1536 = vst [vmem:[%s2949_s4 + $0xa8] sm:$0xff] %v1504_v26  ;;  %v1748_v17 = vmul.f32 -1.442695, %v1179_v55  ;;  %v1183_v24 = vadd.f32 %v1182_v38, %v2920_v48  ;;  %v1220_v20 = vmax.f32 %v1161_v36, 0.0  ;;  %v1446_v62 = vsub.f32 %v1222_v9, %v2887_v2 }
 0x2b8   : > { %v2094_v10 = vpop.eup %2093  ;;  %2103 = vrcp.f32 %v1348_v4  ;;  %v1223_v4 = vmax.f32 %v1177_v43, 0.0  ;;  %v1224_v61 = vmax.f32 %v1181_v60, 0.0 }
 0x2b9   : > { %v1473_v5 = vmul.f32 %v2094_v10, %v1441_v32  ;;  %2105 = vpow2.f32 %v1748_v17  ;;  %v1749_v19 = vmul.f32 -1.442695, %v1183_v24  ;;  %v1444_v13 = vsub.f32 %v1220_v20, %v2872_v41 }
 0x2ba   : > { %v2096_v44 = vpop.eup %2095  ;;  %v1447_v24 = vsub.f32 %v1223_v4, %v2897_v39  ;;  %v1448_v36 = vsub.f32 %v1224_v61, %v2900_v37 }
 0x2bb   : > { %v2098_v52 = vpop.eup %2097  ;;  %v1505_v8 = vadd.f32 %v1473_v5, %v2853_v31  ;;  %v1474_v46 = vmul.f32 %v2096_v44, %v1442_v30  ;;  %2107 = vpow2.f32 %v1749_v19  ;;  %v1186_v45 = vpop.f32.mrb[60].mxu1  ;;  %v1443_v31 = vsub.f32 %v1219_v25, %v2869_v11 }
 0x2bc   : > { %v1349_v56 = vadd.f32 1.0, %v2098_v52  ;;  %v1188_v14 = vpop.f32.mrb[61].mxu1  ;;  %v1187_v0 = vadd.f32 %v1186_v45, %v2928_v63 }
 0x2bd   : > { %v2100_v50 = vpop.eup %2099  ;;  %1537 = vst [vmem:[%s2949_s4 + $0xb0] sm:$0xff] %v1505_v8  ;;  %v1506_v22 = vadd.f32 %v1474_v46, %v2856_v42  ;;  %v1189_v18 = vadd.f32 %v1188_v14, %v2920_v48  ;;  %v1190_v54 = vpop.f32.mrb[62].mxu1 }
 0x2be   : > { %2109 = vrcp.f32 %v1349_v56  ;;  %v1350_v58 = vadd.f32 1.0, %v2100_v50  ;;  %v1192_v49 = vpop.f32.mrb[63].mxu1  ;;  %v1191_v5 = vadd.f32 %v1190_v54, %v2928_v63  ;;  %v1225_v44 = vmax.f32 %v1187_v0, 0.0 }
 0x2bf   : > { %1538 = vst [vmem:[%s2949_s4 + $0xb8] sm:$0xff] %v1506_v22  ;;  %v1750_v35 = vmul.f32 -1.442695, %v1189_v18  ;;  %v1193_v21 = vadd.f32 %v1192_v49, %v2920_v48 }
 0x2c0   : > { %v2102_v15 = vpop.eup %2101  ;;  %2111 = vrcp.f32 %v1350_v58  ;;  %v1226_v8 = vmax.f32 %v1191_v5, 0.0  ;;  %v1449_v46 = vsub.f32 %v1225_v44, %v2908_v6 }
 0x2c1   : > { %v1475_v42 = vmul.f32 %v2102_v15, %v1443_v31  ;;  %2113 = vpow2.f32 %v1750_v35  ;;  %v1751_v34 = vmul.f32 -1.442695, %v1193_v21 }
 0x2c2   : > { %v2104_v27 = vpop.eup %2103  ;;  %v1450_v63 = vsub.f32 %v1226_v8, %v2911_v7 }
 0x2c3   : > { %v2106_v33 = vpop.eup %2105  ;;  %v1507_v47 = vadd.f32 %v1475_v42, %v2869_v11  ;;  %v1476_v23 = vmul.f32 %v2104_v27, %v1444_v13  ;;  %2115 = vpow2.f32 %v1751_v34 }
 0x2c4   : > { %v1351_v48 = vadd.f32 1.0, %v2106_v33 }
 0x2c5   : > { %v2108_v51 = vpop.eup %2107  ;;  %1539 = vst [vmem:[%s2949_s4 + $0xc0] sm:$0xff] %v1507_v47  ;;  %v1508_v16 = vadd.f32 %v1476_v23, %v2872_v41 }
 0x2c6   : > { %2117 = vrcp.f32 %v1351_v48  ;;  %v1352_v40 = vadd.f32 1.0, %v2108_v51 }
 0x2c7   : > { %1540 = vst [vmem:[%s2949_s4 + $0xc8] sm:$0xff] %v1508_v16 }
 0x2c8   : > { %v2110_v57 = vpop.eup %2109  ;;  %2119 = vrcp.f32 %v1352_v40 }
 0x2c9   : > { %v1477_v11 = vmul.f32 %v2110_v57, %v1445_v29 }
 0x2ca   : > { %v2112_v41 = vpop.eup %2111 }
 0x2cb   : > { %v2114_v26 = vpop.eup %2113  ;;  %v1509_v28 = vadd.f32 %v1477_v11, %v2884_v3  ;;  %v1478_v55 = vmul.f32 %v2112_v41, %v1446_v62 }
 0x2cc   : > { %v1353_v38 = vadd.f32 1.0, %v2114_v26 }
 0x2cd   : > { %v2116_v32 = vpop.eup %2115  ;;  %1541 = vst [vmem:[%s2949_s4 + $0xd0] sm:$0xff] %v1509_v28  ;;  %v1510_v59 = vadd.f32 %v1478_v55, %v2887_v2 }
 0x2ce   : > { %2121 = vrcp.f32 %v1353_v38  ;;  %v1354_v17 = vadd.f32 1.0, %v2116_v32 }
 0x2cf   : > { %1542 = vst [vmem:[%s2949_s4 + $0xd8] sm:$0xff] %v1510_v59 }
 0x2d0   : > { %v2118_v10 = vpop.eup %2117  ;;  %2123 = vrcp.f32 %v1354_v17 }
 0x2d1   : > { %v1479_v3 = vmul.f32 %v2118_v10, %v1447_v24 }
 0x2d2   : > { %v2120_v2 = vpop.eup %2119 }
 0x2d3   : > { %v1511_v30 = vadd.f32 %v1479_v3, %v2897_v39  ;;  %v1480_v19 = vmul.f32 %v2120_v2, %v1448_v36 }
 0x2d5   : > { %1543 = vst [vmem:[%s2949_s4 + $0xe0] sm:$0xff] %v1511_v30  ;;  %v1512_v52 = vadd.f32 %v1480_v19, %v2900_v37 }
 0x2d7   : > { %1544 = vst [vmem:[%s2949_s4 + $0xe8] sm:$0xff] %v1512_v52 }
 0x2d8   : > { %v2122_v25 = vpop.eup %2121 }
 0x2d9   : > { %v1481_v45 = vmul.f32 %v2122_v25, %v1449_v46 }
 0x2da   : > { %v2124_v39 = vpop.eup %2123 }
 0x2db   : > { %v1513_v20 = vadd.f32 %v1481_v45, %v2908_v6  ;;  %v1482_v56 = vmul.f32 %v2124_v39, %v1450_v63 }
 0x2dd   : > { %1545 = vst [vmem:[%s2949_s4 + $0xf0] sm:$0xff] %v1513_v20  ;;  %v1514_v37 = vadd.f32 %v1482_v56, %v2911_v7 }
 0x2df   : > { %1546 = vst [vmem:[%s2949_s4 + $0xf8] sm:$0xff] %v1514_v37 }
 0x2e0   : > { %2196 = shalt.err (!%p2193_p7)
}
 0x2e1   : > { %s2197_s7 = scalar_lea.hbm %s3164_s28, 4096  ;;  %s2201_s18 = scalar_lea.hbm %s3216_s3, 8192 }
 0x2e2   : > { %p2198_p9 = scmp.ne.s32.totalorder %s3164_s28, %s2197_s7  ;;  %p2202_p5 = scmp.lt.u32.totalorder %s3164_s28, %s3216_s3 }
 0x2e3   : > { %p2203_p11 = scmp.lt.u32.totalorder %s2201_s18, %s2197_s7  ;;  %p2205_p4 = scmp.lt.u32.totalorder %s2197_s7, %s3164_s28 }
 0x2e4   : > { %p2199_p1 = pnand %p2198_p9, %p2377_p12 }
 0x2e5   : > { %p2204_p2 = por %p2203_p11, %p2202_p5 }
 0x2e6   : > { %p2200_p0 = pneg %p2199_p1 }
 0x2e7   : > { %p2206_p6 = por %p2205_p4, %p2204_p2 }
 0x2e9   : > { %p2207_p8 = pnand %p2206_p6, %p2200_p0 }
 0x2eb   : > { %2210 = shalt.err (!%p2207_p8)
}
 0x2ec   : > { %s2261_s9 = smov 128   ;;  %s2262_s4 = smov 8  }
 0x2ed   : > { %1765 = dma.vmem_to_hbm [thread:$0]  (%p2377_p12), %s3166_s5, 4096, %s3164_s28, %s1548_s16, %s2261_s9, %s2261_s9, %s2262_s4  }
 0x2ee PF: > { %s1576_s25 = sand.u32 1, %s2241_s12   ;;  %p3231_p10 = scmp.ne.s32.totalorder %s3221_s19, 0 }
 0x2ef   : > { %p3232_p13 = scmp.ge.s32.totalorder %s2253_s15, 2  ;;  %s1577_s11 = scalar_lea.sflag [#allocation4], %s1576_s25 }
 0x2f1   : > { %p1776_p3 = pnand %p3232_p13, %p3231_p10 }
 0x2f3   : > { %2236 = dma.done.wait (!%p1776_p3), %s1577_s11, 4096  }
 0x2f4   : > { %2238 = vsyncadd (!%p1776_p3), %s1577_s11, 4294963200  ;;  %p17_p7 = scmp.ge.s32.totalorder %s2339_s24, 4   ;;  %s3233_s12 = smov %s2245_s13 }
 0x2f5   : > { %s3234_s13 = smov %s2249_s14  ;;  %s3235_s14 = smov %s2373_s17 }
 0x2f6   : > { %s3236_s15 = smov %s2339_s24  ;;  %19 = sbr.rel (!%p17_p7) target bundleno = 6 (0x6), region = 83 }
 0x2fd   :  { %1582 = vsyncpa [#allocation3], 1 }
 0x2fe   :  { %1584 = vsyncpa [#allocation3 + $0x1], 1 }
 0x2ff   :  { %1585 = vsyncpa [#allocation6], 1 }
 0x300   :  { %1586 = vsyncpa [#allocation4], 1 }
 0x301   :  { %1588 = vsyncpa [#allocation4 + $0x1], 1 }

</bundles_post_ra>
